<compile_context>
chip_gen: v5e
topology: v5e:2x2
jax: 0.10.0
libtpu: 0.0.40
codegen_flags: <defaults>
</compile_context>

<pallas_src>
import jax
import jax.numpy as jnp
from jax.experimental import pallas as pl
from jax.experimental.pallas import tpu as pltpu


# ---------------------------------------------------------------------------
# Kernel
# ---------------------------------------------------------------------------
def _fused_mlp_kernel(x_ref, w13_ref, w2t_ref, rw_ref, o_ref, acc_ref):
    # Grid: (token-tile i [parallel], hidden-tile j [arbitrary / reduction]).
    #   x_ref:   (TS, F)       gathered-token tile (same block across j)
    #   w13_ref: (F, 2*tH)     fused [W1t | W3t] slab for hidden slice j
    #   w2t_ref: (tH, F)       W2t slab for hidden slice j
    #   rw_ref:  (TS, 1)       per-selected-token routing weight
    #   o_ref:   (TS, F)       output tile (block constant over j -> resident)
    #   acc_ref: (TS, F) f32   VMEM accumulator across the hidden reduction
    j = pl.program_id(1)

    @pl.when(j == 0)
    def _():
        acc_ref[...] = jnp.zeros_like(acc_ref)

    w13 = w13_ref[...]
    w2t = w2t_ref[...]
    th = w2t_ref.shape[0]

    # Single wide first GEMM: x @ [W1t | W3t]  ->  (TS, 2*tH).
    # Inputs cast to the weight dtype (bf16 in production), f32 accumulation.
    x = x_ref[...].astype(w13.dtype)
    gu = jnp.dot(x, w13, preferred_element_type=jnp.float32)
    g = gu[:, :th]
    u = gu[:, th:]
    h = (g * jax.nn.sigmoid(g)) * u          # fused SiLU gate, f32 VPU/EUP math

    # Second GEMM, accumulated over hidden tiles into f32 VMEM scratch.
    acc_ref[...] += jnp.dot(h.astype(w2t.dtype), w2t,
                            preferred_element_type=jnp.float32)

    @pl.when(j == pl.num_programs(1) - 1)
    def _():
        o_ref[...] = (acc_ref[...] * rw_ref[...].astype(jnp.float32)
                      ).astype(o_ref.dtype)


# ---------------------------------------------------------------------------
# One-time (init) weight preparation: transpose + fuse W1/W3 per hidden tile.
# ---------------------------------------------------------------------------
def prepare_expert_weights(w1, w2, w3, *, tile_h, compute_dtype=None):
    """w1,w3: [H, F]; w2: [F, H]  ->  {'w13': [F, 2H], 'w2t': [H, F], 'tile_h': tH}

    Done ONCE at init (not per call), so the kernel never re-transposes weights.
    The w13 layout interleaves per-H-tile slabs: columns [j*2tH, j*2tH+tH) hold the
    W1t tile j and [j*2tH+tH, (j+1)*2tH) hold the W3t tile j, so each grid step
    reads one contiguous (F, 2tH) block and does a single wide MXU matmul.
    """
    H, F = w1.shape
    assert w3.shape == (H, F) and w2.shape == (F, H)
    assert H % tile_h == 0, "hidden_dim must be a multiple of tile_h (pad at init)"
    dt = compute_dtype if compute_dtype is not None else w1.dtype
    n_h = H // tile_h
    w1t = w1.T.reshape(F, n_h, tile_h)
    w3t = w3.T.reshape(F, n_h, tile_h)
    w13 = jnp.concatenate([w1t, w3t], axis=-1).reshape(F, 2 * H).astype(dt)
    w2t = w2.T.astype(dt)                                   # [H, F]
    return {"w13": w13, "w2t": w2t, "tile_h": tile_h}


# ---------------------------------------------------------------------------
# Pallas hot path: fused expert MLP over the gathered (and padded) tokens.
# ---------------------------------------------------------------------------
def fused_expert_mlp(x_sel, rw_sel, prepared, *, tile_s=128,
                     vmem_limit_bytes=48 << 20):
    """x_sel: [S, F] (S a multiple of tile_s), rw_sel: [S, 1]  ->  [S, F]."""
    S, F = x_sel.shape
    w13, w2t, tile_h = prepared["w13"], prepared["w2t"], prepared["tile_h"]
    H = w2t.shape[0]
    assert S % tile_s == 0 and H % tile_h == 0

    grid_spec = pltpu.PrefetchScalarGridSpec(
        num_scalar_prefetch=0,
        grid=(S // tile_s, H // tile_h),            # reduction (H) axis last
        in_specs=[
            pl.BlockSpec((tile_s, F), lambda i, j: (i, 0)),        # x tile
            pl.BlockSpec((F, 2 * tile_h), lambda i, j: (0, j)),    # [W1t|W3t] slab
            pl.BlockSpec((tile_h, F), lambda i, j: (j, 0)),        # W2t slab
            pl.BlockSpec((tile_s, 1), lambda i, j: (i, 0)),        # routing weights
        ],
        out_specs=pl.BlockSpec((tile_s, F), lambda i, j: (i, 0)),  # resident over j
        scratch_shapes=[pltpu.VMEM((tile_s, F), jnp.float32)],     # f32 accumulator
    )

    return pl.pallas_call(
        _fused_mlp_kernel,
        out_shape=jax.ShapeDtypeStruct((S, F), x_sel.dtype),
        grid_spec=grid_spec,
        compiler_params=pltpu.CompilerParams(
            dimension_semantics=("parallel", "arbitrary"),
            # v7x: keep resident VMEM (incl. double-buffering) under ~48 MiB.
            # v5e/v6e: 128 MiB physical; this can be raised (e.g. 96<<20) with
            # correspondingly larger tile_h / tile_s.
            vmem_limit_bytes=vmem_limit_bytes),
    )(x_sel, w13, w2t, rw_sel)


# ---------------------------------------------------------------------------
# Full forward (mirrors SSFusedTransMLP.forward).
# ---------------------------------------------------------------------------
def ss_fused_trans_mlp(hidden_states, input_idx, routing_weights, prepared,
                       *, tile_s=128):
    """hidden_states: [T, ffn_dim]; input_idx: [S] int32; routing_weights: [T, 1]."""
    T, F = hidden_states.shape
    S = input_idx.shape[0]

    # glue: gather the routed tokens + their routing weights (data-dependent).
    # TODO(synk): fuse the gather/scatter into the kernel (scalar-prefetched
    # input_idx + pl.Element row blocks or a manual DMA gather) to avoid the
    # extra HBM round-trip of x_sel / y_sel at large S.
    x_sel = hidden_states[input_idx]                          # [S, F]
    rw_sel = routing_weights.T[0, input_idx][:, None]         # [S, 1]

    # pad the selected-token axis up to the token tile (zero rows are harmless:
    # SiLU(0)*0 -> 0 -> scaled by 0-padded routing weight -> 0).
    S_pad = pl.cdiv(S, tile_s) * tile_s
    if S_pad != S:
        x_sel = jnp.pad(x_sel, ((0, S_pad - S), (0, 0)))
        rw_sel = jnp.pad(rw_sel, ((0, S_pad - S), (0, 0)))

    y = fused_expert_mlp(x_sel, rw_sel, prepared, tile_s=tile_s)[:S]

    # glue: scatter-add back into the full [T, ffn_dim] output.
    out = jnp.zeros((T, F), dtype=y.dtype).at[input_idx].add(y)
    return out


# ---------------------------------------------------------------------------
# Pure-JAX reference (f32)
# ---------------------------------------------------------------------------
def _reference(hidden_states, input_idx, routing_weights, w1, w2, w3):
    x = hidden_states[input_idx].astype(jnp.float32)
    w1f, w2f, w3f = (w.astype(jnp.float32) for w in (w1, w2, w3))
    h = jax.nn.silu(x @ w1f.T) * (x @ w3f.T)
    rw = routing_weights.astype(jnp.float32).T[0, input_idx][:, None]
    y = (h @ w2f.T) * rw
    out = jnp.zeros((hidden_states.shape[0], hidden_states.shape[1]),
                    dtype=jnp.float32).at[input_idx].add(y)
    return out


if __name__ == "__main__":
    # Small demo shapes consistent with the module (lane-dense: F multiple of 128):
    #   ffn_dim (token feature dim) F = 256, hidden_dim H = 512,
    #   T = 64 tokens total, S = 24 tokens routed to this expert.
    ffn_dim, hidden_dim = 256, 512
    T, S = 64, 24
    tile_s, tile_h = 128, 256          # demo tiles; re-derive per generation VMEM

    key = jax.random.PRNGKey(0)
    k_x, k_w1, k_w2, k_w3, k_rw, k_idx = jax.random.split(key, 6)

    # nn.Linear(ffn_dim -> hidden_dim): weight [hidden_dim, ffn_dim]
    w1 = jax.random.normal(k_w1, (hidden_dim, ffn_dim), jnp.float32) * 0.05
    # nn.Linear(hidden_dim -> ffn_dim): weight [ffn_dim, hidden_dim]
    w2 = jax.random.normal(k_w2, (ffn_dim, hidden_dim), jnp.float32) * 0.05
    w3 = jax.random.normal(k_w3, (hidden_dim, ffn_dim), jnp.float32) * 0.05
    # NOTE: act_fn (SiLU) is fused into w1 exactly as in the original forward.

    hidden_states = jax.random.normal(k_x, (T, ffn_dim), jnp.float32)
    input_idx = jax.random.permutation(k_idx, T)[:S].astype(jnp.int32)
    routing_weights = jax.nn.softmax(
        jax.random.normal(k_rw, (T, 1), jnp.float32), axis=0)

    # ---- f32 path (tight correctness check) -------------------------------
    prepared_f32 = prepare_expert_weights(w1, w2, w3, tile_h=tile_h,
                                          compute_dtype=jnp.float32)
    out = ss_fused_trans_mlp(hidden_states, input_idx, routing_weights,
                             prepared_f32, tile_s=tile_s)
    out = jax.block_until_ready(out)

    ref = _reference(hidden_states, input_idx, routing_weights, w1, w2, w3)
    assert out.shape == (T, ffn_dim)
    assert jnp.allclose(out, ref, atol=1e-4, rtol=1e-4), "f32 mismatch vs reference"

    # ---- bf16-weight / bf16-activation path (production recipe on v6e/v7x) --
    prepared_bf16 = prepare_expert_weights(w1, w2, w3, tile_h=tile_h,
                                           compute_dtype=jnp.bfloat16)
    hs_bf16 = hidden_states.astype(jnp.bfloat16)
    out_bf16 = ss_fused_trans_mlp(hs_bf16, input_idx, routing_weights,
                                  prepared_bf16, tile_s=tile_s)
    out_bf16 = jax.block_until_ready(out_bf16)
    ref_bf16 = _reference(hs_bf16, input_idx, routing_weights,
                          w1.astype(jnp.bfloat16), w2.astype(jnp.bfloat16),
                          w3.astype(jnp.bfloat16))
    assert jnp.allclose(out_bf16.astype(jnp.float32), ref_bf16,
                        atol=2e-2, rtol=1e-1), "bf16 mismatch vs reference"

    print("KERNEL_OK")
</pallas_src>

<mosaic_0001>
module attributes {stable_mosaic.version = 11 : i64} {
  func.func @_fused_mlp_kernel(%arg0: i32, %arg1: i32, %arg2: memref<128x256xf32, #tpu.memory_space<vmem>>, %arg3: memref<256x512xf32, #tpu.memory_space<vmem>>, %arg4: memref<256x256xf32, #tpu.memory_space<vmem>>, %arg5: memref<128x1xf32, #tpu.memory_space<vmem>>, %arg6: memref<128x256xf32, #tpu.memory_space<vmem>>, %arg7: memref<128x256xf32, #tpu.memory_space<vmem>>) attributes {dimension_semantics = [#tpu.dimension_semantics<parallel>, #tpu.dimension_semantics<arbitrary>], iteration_bounds = array<i64: 1, 2>, scalar_prefetch = 0 : i64, scratch_operands = 1 : i64, tpu.core_type = #tpu.core_type<tc>, window_params = [{transform_indices = @transform_0, window_bounds = array<i64: 128, 256>}, {transform_indices = @transform_1, window_bounds = array<i64: 256, 512>}, {transform_indices = @transform_2, window_bounds = array<i64: 256, 256>}, {transform_indices = @transform_3, window_bounds = array<i64: 128, 1>}, {transform_indices = @transform_4, window_bounds = array<i64: 128, 256>}]} {
    %c0_i32 = arith.constant 0 : i32
    %0 = arith.cmpi eq, %arg1, %c0_i32 : i32
    %1 = arith.extui %0 : i1 to i32
    %c0_i32_0 = arith.constant 0 : i32
    %2 = arith.cmpi ne, %1, %c0_i32_0 : i32
    scf.if %2 {
      %cst_13 = arith.constant 0.000000e+00 : f32
      %23 = vector.broadcast %cst_13 : f32 to vector<128x256xf32>
      %c0_14 = arith.constant 0 : index
      %c0_15 = arith.constant 0 : index
      %24 = vector.load %arg7[%c0_14, %c0_15] : memref<128x256xf32, #tpu.memory_space<vmem>>, vector<128x256xf32>
      tpu.vector_store %arg7[%c0_14, %c0_15], %23 {strides = array<i32>} : memref<128x256xf32, #tpu.memory_space<vmem>>, vector<128x256xf32>,
    } else {
    }
    %c0 = arith.constant 0 : index
    %c0_1 = arith.constant 0 : index
    %3 = vector.load %arg3[%c0, %c0_1] : memref<256x512xf32, #tpu.memory_space<vmem>>, vector<256x512xf32>
    %c0_2 = arith.constant 0 : index
    %c0_3 = arith.constant 0 : index
    %4 = vector.load %arg4[%c0_2, %c0_3] : memref<256x256xf32, #tpu.memory_space<vmem>>, vector<256x256xf32>
    %c0_4 = arith.constant 0 : index
    %c0_5 = arith.constant 0 : index
    %5 = vector.load %arg2[%c0_4, %c0_5] : memref<128x256xf32, #tpu.memory_space<vmem>>, vector<128x256xf32>
    %cst = arith.constant dense<0.000000e+00> : vector<128x512xf32>
    %6 = tpu.matmul %5, %3, %cst {dimension_numbers = #tpu.dot_dimension_numbers<[1], [0], [0], [1], [0, 0, 1, 1], [], []>} : vector<128x256xf32>, vector<256x512xf32>, vector<128x512xf32> -> vector<128x512xf32>
    %7 = vector.extract_strided_slice %6 {offsets = [0, 0], sizes = [128, 256], strides = [1, 1]} : vector<128x512xf32> to vector<128x256xf32>
    %8 = vector.extract_strided_slice %6 {offsets = [0, 256], sizes = [128, 256], strides = [1, 1]} : vector<128x512xf32> to vector<128x256xf32>
    %9 = arith.negf %7 : vector<128x256xf32>
    %10 = math.exp %9 : vector<128x256xf32>
    %cst_6 = arith.constant 1.000000e+00 : f32
    %11 = vector.broadcast %cst_6 : f32 to vector<128x256xf32>
    %12 = arith.addf %11, %10 : vector<128x256xf32>
    %13 = arith.divf %11, %12 : vector<128x256xf32>
    %14 = arith.mulf %7, %13 : vector<128x256xf32>
    %15 = arith.mulf %14, %8 : vector<128x256xf32>
    %c0_7 = arith.constant 0 : index
    %c0_8 = arith.constant 0 : index
    %16 = vector.load %arg7[%c0_7, %c0_8] : memref<128x256xf32, #tpu.memory_space<vmem>>, vector<128x256xf32>
    %cst_9 = arith.constant dense<0.000000e+00> : vector<128x256xf32>
    %17 = tpu.matmul %15, %4, %cst_9 {dimension_numbers = #tpu.dot_dimension_numbers<[1], [0], [0], [1], [0, 0, 1, 1], [], []>} : vector<128x256xf32>, vector<256x256xf32>, vector<128x256xf32> -> vector<128x256xf32>
    %18 = arith.addf %16, %17 : vector<128x256xf32>
    %c0_10 = arith.constant 0 : index
    %c0_11 = arith.constant 0 : index
    %19 = vector.load %arg7[%c0_10, %c0_11] : memref<128x256xf32, #tpu.memory_space<vmem>>, vector<128x256xf32>
    tpu.vector_store %arg7[%c0_10, %c0_11], %18 {strides = array<i32>} : memref<128x256xf32, #tpu.memory_space<vmem>>, vector<128x256xf32>,
    %c1_i32 = arith.constant 1 : i32
    %20 = arith.cmpi eq, %arg1, %c1_i32 : i32
    %21 = arith.extui %20 : i1 to i32
    %c0_i32_12 = arith.constant 0 : i32
    %22 = arith.cmpi ne, %21, %c0_i32_12 : i32
    scf.if %22 {
      %c0_13 = arith.constant 0 : index
      %c0_14 = arith.constant 0 : index
      %23 = vector.load %arg7[%c0_13, %c0_14] : memref<128x256xf32, #tpu.memory_space<vmem>>, vector<128x256xf32>
      %c0_15 = arith.constant 0 : index
      %c0_16 = arith.constant 0 : index
      %24 = vector.load %arg5[%c0_15, %c0_16] : memref<128x1xf32, #tpu.memory_space<vmem>>, vector<128x1xf32>
      %25 = vector.broadcast %24 : vector<128x1xf32> to vector<128x256xf32>
      %26 = arith.mulf %23, %25 : vector<128x256xf32>
      %c0_17 = arith.constant 0 : index
      %c0_18 = arith.constant 0 : index
      %27 = vector.load %arg6[%c0_17, %c0_18] : memref<128x256xf32, #tpu.memory_space<vmem>>, vector<128x256xf32>
      tpu.vector_store %arg6[%c0_17, %c0_18], %26 {strides = array<i32>} : memref<128x256xf32, #tpu.memory_space<vmem>>, vector<128x256xf32>,
    } else {
    }
    return
  }
  func.func @transform_0(%arg0: i32, %arg1: i32) -> (i32, i32) {
    %c0_i32 = arith.constant 0 : i32
    %c0_i32_0 = arith.constant 0 : i32
    return %arg0, %c0_i32 : i32, i32
  }
  func.func @transform_1(%arg0: i32, %arg1: i32) -> (i32, i32) {
    %c0_i32 = arith.constant 0 : i32
    %c0_i32_0 = arith.constant 0 : i32
    return %c0_i32, %arg1 : i32, i32
  }
  func.func @transform_2(%arg0: i32, %arg1: i32) -> (i32, i32) {
    %c0_i32 = arith.constant 0 : i32
    %c0_i32_0 = arith.constant 0 : i32
    return %arg1, %c0_i32 : i32, i32
  }
  func.func @transform_3(%arg0: i32, %arg1: i32) -> (i32, i32) {
    %c0_i32 = arith.constant 0 : i32
    %c0_i32_0 = arith.constant 0 : i32
    return %arg0, %c0_i32 : i32, i32
  }
  func.func @transform_4(%arg0: i32, %arg1: i32) -> (i32, i32) {
    %c0_i32 = arith.constant 0 : i32
    %c0_i32_0 = arith.constant 0 : i32
    return %arg0, %c0_i32 : i32, i32
  }
}

</mosaic_0001>

<bundles_post_ra>
// kernel: tpu_custom_call.1
= control target key start
LH: loop header
LB: loop body
LE: loop exit
PB: predicated region body
PF: predicated region fallthrough
CT: control target
= control target key end

     0   :  { %9 = vsyncpa [#allocation4], 0  ;;  %s4860_s0 = inlined_call_operand.hbm [shape: f32[128,256], index: 0, kind: input, shape index: {}]   ;;  %s4861_s1 = inlined_call_operand.hbm [shape: f32[256,1024], index: 1, kind: input, shape index: {}]   ;;  %s4862_s2 = inlined_call_operand.hbm [shape: f32[512,256], index: 2, kind: input, shape index: {}]   ;;  %s4863_s3 = inlined_call_operand.vmem [shape: f32[128,1], index: 3, kind: input, shape index: {}]   ;;  %s4864_s4 = inlined_call_operand.hbm [shape: f32[128,256], index: 4, kind: output, shape index: {}]  }
   0x1   :  { %10 = vsyncpa [#allocation7], 0 }
   0x2   :  { %12 = vsyncpa [#allocation7 + $0x1], 0 }
   0x3   :  { %13 = vsyncpa [#allocation5], 0  ;;  %s2933_s15 = smov 0   ;;  %s2935_s16 = smov 0  }
   0x4   :  { %s2937_s17 = smov 0   ;;  %s2939_s18 = smov 0  }
   0x5   :  { %s2941_s19 = smov 0   ;;  %s2943_s20 = smov 0  }
   0x6 LB: > { %s28_s21 = sadd.s32 1, %s2891_s19  ;;  %s64_s22 = sadd.s32 1, %s2883_s17  ;;  %s2895_s20 = sphi %s2943_s20, %s19_s20   ;;  %s2891_s19 = sphi %s2941_s19, %s5037_s19   ;;  %s2887_s18 = sphi %s2939_s18, %s5036_s18   ;;  %s2883_s17 = sphi %s2937_s17, %s5035_s17   ;;  %s2879_s16 = sphi %s2935_s16, %s5034_s16   ;;  %s2875_s15 = sphi %s2933_s15, %s5033_s15  }
   0x7   : > { %p29_p0 = scmp.ge.s32.totalorder %s28_s21, 2  ;;  %p71_p1 = scmp.ne.s32.totalorder %s2883_s17, %s2879_s16 }
   0x8   : > { %p72_p2 = scmp.eq.s32.totalorder %s2895_s20, 0  ;;  %p2525_p4 = scmp.lt.s32.totalorder %s2895_s20, 2 }
   0x9   : > { %s5039_s21 = smov (%p29_p0, %s28_s21), 0  ;;  %s206_s25 = sand.u32 1, %s2895_s20  }
   0xa   : > { %p2970_p3 = por %p72_p2, %p71_p1  ;;  %s61_s24 = ssub.s32 %s2891_s19, %s5039_s21 }
   0xb   : > { %p62_p5 = scmp.eq.s32.totalorder %s61_s24, 0  ;;  %s208_s26 = sand.u32 1, %s2883_s17  }
   0xc   : > { %s2498_s27 = sshll.u32 %s2891_s19, 5  ;;  %s2449_s29 = sshll.u32 %s208_s26, 10 }
   0xd   : > { %s2981_s28 = scalar_select %p62_p5, %s2883_s17, %s64_s22  }
   0xe   : > { %s215_s6 = scalar_lea.hbm %s4861_s1, %s2498_s27  ;;  %s210_s8 = scalar_lea.vmem [#allocation6], %s2449_s29 }
   0xf   : > { %s216_s7 = sshll.u32 %s215_s6, 4  ;;  %s218_s9 = sshll.u32 %s210_s8, 4  ;;  %s217_s7 = int_to_ptr.hbm [resolvable:$true] %s216_s7  ;;  %s219_s9 = int_to_ptr.vmem [resolvable:$true] %s218_s9 }
  0x10   : > { %p2990_p6 = pnand %p2525_p4, %p2970_p3  ;;  %s2994_s11 = scalar_lea.sflag [#allocation7], %s206_s25 }
  0x11   : > { %s2897_s12 = smov 1024   ;;  %s2898_s13 = smov 512  }
  0x12   : > { %s2899_s14 = smov 32   ;;  %s3000_s22 = sadd.s32 4294967295, %s2895_s20  }
  0x13   : > { %2520 = dma.hbm_to_vmem [thread:$0]  (!%p2990_p6), %s217_s7, 16384, %s219_s9, %s2994_s11, %s2897_s12, %s2898_s13, %s2899_s14  }
  0x14   : > { %p77_p7 = scmp.ne.s32.totalorder %s2879_s16, %s2875_s15  ;;  %p78_p8 = scmp.eq.s32.totalorder %s3000_s22, 0 }
  0x15   : > { %p2445_p9 = scmp.ge.s32.totalorder %s2895_s20, 1  ;;  %p166_p10 = scmp.lt.s32.totalorder %s2895_s20, 3 }
  0x16   : > { %p3009_p11 = por %p78_p8, %p77_p7  ;;  %s181_s27 = sshll.u32 %s4860_s0, 4  ;;  %s182_s27 = int_to_ptr.hbm [resolvable:$true] %s181_s27 }
  0x17   : > { %p3016_p12 = pnand %p2445_p9, %p166_p10  ;;  %s2900_s15 = smov [#allocation3]  }
  0x18   : > { %s183_s30 = sshll.u32 %s2900_s15, 4  ;;  %s2452_s5 = sshll.u32 %s208_s26, 9  ;;  %s184_s30 = int_to_ptr.vmem [resolvable:$true] %s183_s30 }
  0x19   : > { %p2513_p13 = pneg %p3016_p12  ;;  %s2500_s6 = sshll.u32 %s2891_s19, 9 }
  0x1a   : > { %s238_s9 = scalar_lea.hbm %s4862_s2, %s2500_s6  ;;  %s2901_s12 = smov 256  }
  0x1b   : > { %p2514_p0 = pnand %p2513_p13, %p78_p8  ;;  %s2902_s13 = smov 16  }
  0x1c   : > { %s239_s14 = sshll.u32 %s238_s9, 4  ;;  %s232_s24 = scalar_lea.vmem [#allocation8], %s2452_s5  ;;  %s240_s14 = int_to_ptr.hbm [resolvable:$true] %s239_s14 }
  0x1d   : > { %2516 = dma.hbm_to_vmem [thread:$0]  (!%p2514_p0), %s182_s27, 4096, %s184_s30, [#allocation4], %s2901_s12, %s2901_s12, %s2902_s13  }
  0x1e   : > { %s241_s25 = sshll.u32 %s232_s24, 4  ;;  %253 = sbr.rel (%p3016_p12) target bundleno = 818 (0x332), region = 36  ;;  %s242_s25 = int_to_ptr.vmem [resolvable:$true] %s241_s25 }
  0x1f   : > { %2523 = dma.hbm_to_vmem [thread:$0]  (!%p2990_p6), %s240_s14, 8192, %s242_s25, %s2994_s11, %s2901_s12, %s2901_s12, %s2902_s13  }
  0x23   : > { %2862 = dma.done.wait (%p78_p8), [#allocation4], 4096  }
  0x24   : > { %2864 = vsyncadd (%p78_p8), [#allocation4], 4294963200  ;;  %s260_s26 = sand.u32 1, %s3000_s22   ;;  %s262_s27 = sand.u32 1, %s2879_s16  }
  0x25   : > { %s2458_s15 = sshll.u32 %s262_s27, 10  ;;  %s261_s30 = scalar_lea.sflag [#allocation7], %s260_s26 }
  0x26   : > { %s3039_s5 = scalar_lea.vmem [#allocation6], %s2458_s15 }
  0x27   : > { %2866 = dma.done.wait (%p3009_p11), %s261_s30, 24576  }
  0x28   : > { %2868 = vsyncadd (%p3009_p11), %s261_s30, 4294942720  ;;  %s2459_s10 = sshll.u32 %s262_s27, 9  ;;  %p2460_p1 = scmp.ne.s32.totalorder %s2887_s18, 0 }
  0x29   : > { %s3045_s11 = scalar_lea.vmem [#allocation8], %s2459_s10 }
  0x2a   : > { %318 = sbr.rel (%p2460_p1) target bundleno = 80 (0x50), region = 52 }
  0x2f   : > { %v2903_v0 = vmov 0.0  }
  0x30   : > { %319 = vst [vmem:[#allocation2 + $0xb0] sm:$0xff] %v2903_v0 }
  0x31   : > { %320 = vst [vmem:[#allocation2] sm:$0xff] %v2903_v0 }
  0x32   : > { %321 = vst [vmem:[#allocation2 + $0xd8] sm:$0xff] %v2903_v0 }
  0x33   : > { %322 = vst [vmem:[#allocation2 + $0x18] sm:$0xff] %v2903_v0 }
  0x34   : > { %323 = vst [vmem:[#allocation2 + $0x50] sm:$0xff] %v2903_v0 }
  0x35   : > { %324 = vst [vmem:[#allocation2 + $0x68] sm:$0xff] %v2903_v0 }
  0x36   : > { %325 = vst [vmem:[#allocation2 + $0x30] sm:$0xff] %v2903_v0 }
  0x37   : > { %326 = vst [vmem:[#allocation2 + $0x48] sm:$0xff] %v2903_v0 }
  0x38   : > { %327 = vst [vmem:[#allocation2 + $0x80] sm:$0xff] %v2903_v0 }
  0x39   : > { %328 = vst [vmem:[#allocation2 + $0x88] sm:$0xff] %v2903_v0 }
  0x3a   : > { %329 = vst [vmem:[#allocation2 + $0xe8] sm:$0xff] %v2903_v0 }
  0x3b   : > { %330 = vst [vmem:[#allocation2 + $0xb8] sm:$0xff] %v2903_v0 }
  0x3c   : > { %331 = vst [vmem:[#allocation2 + $0x60] sm:$0xff] %v2903_v0 }
  0x3d   : > { %332 = vst [vmem:[#allocation2 + $0xf0] sm:$0xff] %v2903_v0 }
  0x3e   : > { %333 = vst [vmem:[#allocation2 + $0x8] sm:$0xff] %v2903_v0 }
  0x3f   : > { %334 = vst [vmem:[#allocation2 + $0x78] sm:$0xff] %v2903_v0 }
  0x40   : > { %335 = vst [vmem:[#allocation2 + $0x38] sm:$0xff] %v2903_v0 }
  0x41   : > { %336 = vst [vmem:[#allocation2 + $0x58] sm:$0xff] %v2903_v0 }
  0x42   : > { %337 = vst [vmem:[#allocation2 + $0x40] sm:$0xff] %v2903_v0 }
  0x43   : > { %338 = vst [vmem:[#allocation2 + $0xc8] sm:$0xff] %v2903_v0 }
  0x44   : > { %339 = vst [vmem:[#allocation2 + $0xe0] sm:$0xff] %v2903_v0 }
  0x45   : > { %340 = vst [vmem:[#allocation2 + $0x90] sm:$0xff] %v2903_v0 }
  0x46   : > { %341 = vst [vmem:[#allocation2 + $0x70] sm:$0xff] %v2903_v0 }
  0x47   : > { %342 = vst [vmem:[#allocation2 + $0xc0] sm:$0xff] %v2903_v0 }
  0x48   : > { %343 = vst [vmem:[#allocation2 + $0xa8] sm:$0xff] %v2903_v0 }
  0x49   : > { %344 = vst [vmem:[#allocation2 + $0xd0] sm:$0xff] %v2903_v0 }
  0x4a   : > { %345 = vst [vmem:[#allocation2 + $0x10] sm:$0xff] %v2903_v0 }
  0x4b   : > { %346 = vst [vmem:[#allocation2 + $0x28] sm:$0xff] %v2903_v0 }
  0x4c   : > { %347 = vst [vmem:[#allocation2 + $0xa0] sm:$0xff] %v2903_v0 }
  0x4d   : > { %348 = vst [vmem:[#allocation2 + $0xf8] sm:$0xff] %v2903_v0 }
  0x4e   : > { %349 = vst [vmem:[#allocation2 + $0x20] sm:$0xff] %v2903_v0 }
  0x4f   : > { %350 = vst [vmem:[#allocation2 + $0x98] sm:$0xff] %v2903_v0 }
  0x50 PF: > { %v411_v1 = vld [vmem:[%s3039_s5 + $0x1e0] sm:$0xff]  ;;  %v412_v3 = vld [vmem:[%s3039_s5 + $0x1e8] sm:$0xff]  ;;  %p2493_p2 = scmp.ne.s32.totalorder %s2887_s18, 1 }
  0x51   : > { %v475_v2 = vld [vmem:[%s3039_s5 + $0x3e0] sm:$0xff]  ;;  %575 = vmatpush.msra.mxu0 %v411_v1  ;;  %v476_v4 = vld [vmem:[%s3039_s5 + $0x3e8] sm:$0xff]  ;;  %705 = vmatpush.msra.mxu2 %v412_v3  ;;  %v414_v3 = vld [vmem:[%s3039_s5 + $0x1f8] sm:$0xff] }
  0x52   : > { %640 = vmatpush.msra.mxu1 %v475_v2  ;;  %v407_v5 = vld [vmem:[%s3039_s5 + $0x1c0] sm:$0xff]  ;;  %770 = vmatpush.msra.mxu3 %v476_v4  ;;  %v408_v7 = vld [vmem:[%s3039_s5 + $0x1c8] sm:$0xff]  ;;  %v478_v4 = vld [vmem:[%s3039_s5 + $0x3f8] sm:$0xff] }
  0x53   : > { %v471_v6 = vld [vmem:[%s3039_s5 + $0x3c0] sm:$0xff]  ;;  %v472_v8 = vld [vmem:[%s3039_s5 + $0x3c8] sm:$0xff]  ;;  %576 = vmatpush.msra.mxu0 %v407_v5  ;;  %706 = vmatpush.msra.mxu2 %v408_v7  ;;  %v413_v5 = vld [vmem:[%s3039_s5 + $0x1f0] sm:$0xff] }
  0x54   : > { %v403_v9 = vld [vmem:[%s3039_s5 + $0x1a0] sm:$0xff]  ;;  %641 = vmatpush.msra.mxu1 %v471_v6  ;;  %v404_v11 = vld [vmem:[%s3039_s5 + $0x1a8] sm:$0xff]  ;;  %771 = vmatpush.msra.mxu3 %v472_v8  ;;  %v477_v6 = vld [vmem:[%s3039_s5 + $0x3f0] sm:$0xff] }
  0x55   : > { %v467_v10 = vld [vmem:[%s3039_s5 + $0x3a0] sm:$0xff]  ;;  %v468_v12 = vld [vmem:[%s3039_s5 + $0x3a8] sm:$0xff]  ;;  %577 = vmatpush.msra.mxu0 %v403_v9  ;;  %707 = vmatpush.msra.mxu2 %v404_v11  ;;  %v410_v7 = vld [vmem:[%s3039_s5 + $0x1d8] sm:$0xff] }
  0x56   : > { %v399_v13 = vld [vmem:[%s3039_s5 + $0x180] sm:$0xff]  ;;  %642 = vmatpush.msra.mxu1 %v467_v10  ;;  %v400_v15 = vld [vmem:[%s3039_s5 + $0x188] sm:$0xff]  ;;  %772 = vmatpush.msra.mxu3 %v468_v12  ;;  %v474_v8 = vld [vmem:[%s3039_s5 + $0x3d8] sm:$0xff] }
  0x57   : > { %v463_v14 = vld [vmem:[%s3039_s5 + $0x380] sm:$0xff]  ;;  %v464_v16 = vld [vmem:[%s3039_s5 + $0x388] sm:$0xff]  ;;  %578 = vmatpush.msra.mxu0 %v399_v13  ;;  %708 = vmatpush.msra.mxu2 %v400_v15  ;;  %v409_v9 = vld [vmem:[%s3039_s5 + $0x1d0] sm:$0xff] }
  0x58   : > { %v395_v17 = vld [vmem:[%s3039_s5 + $0x160] sm:$0xff]  ;;  %643 = vmatpush.msra.mxu1 %v463_v14  ;;  %v396_v19 = vld [vmem:[%s3039_s5 + $0x168] sm:$0xff]  ;;  %773 = vmatpush.msra.mxu3 %v464_v16  ;;  %v473_v10 = vld [vmem:[%s3039_s5 + $0x3d0] sm:$0xff] }
  0x59   : > { %v459_v18 = vld [vmem:[%s3039_s5 + $0x360] sm:$0xff]  ;;  %v460_v20 = vld [vmem:[%s3039_s5 + $0x368] sm:$0xff]  ;;  %579 = vmatpush.msra.mxu0 %v395_v17  ;;  %709 = vmatpush.msra.mxu2 %v396_v19  ;;  %v406_v11 = vld [vmem:[%s3039_s5 + $0x1b8] sm:$0xff] }
  0x5a   : > { %v391_v21 = vld [vmem:[%s3039_s5 + $0x140] sm:$0xff]  ;;  %644 = vmatpush.msra.mxu1 %v459_v18  ;;  %v392_v23 = vld [vmem:[%s3039_s5 + $0x148] sm:$0xff]  ;;  %774 = vmatpush.msra.mxu3 %v460_v20  ;;  %v470_v12 = vld [vmem:[%s3039_s5 + $0x3b8] sm:$0xff] }
  0x5b   : > { %v455_v22 = vld [vmem:[%s3039_s5 + $0x340] sm:$0xff]  ;;  %v456_v24 = vld [vmem:[%s3039_s5 + $0x348] sm:$0xff]  ;;  %580 = vmatpush.msra.mxu0 %v391_v21  ;;  %710 = vmatpush.msra.mxu2 %v392_v23  ;;  %v405_v13 = vld [vmem:[%s3039_s5 + $0x1b0] sm:$0xff] }
  0x5c   : > { %v387_v25 = vld [vmem:[%s3039_s5 + $0x120] sm:$0xff]  ;;  %645 = vmatpush.msra.mxu1 %v455_v22  ;;  %v388_v27 = vld [vmem:[%s3039_s5 + $0x128] sm:$0xff]  ;;  %775 = vmatpush.msra.mxu3 %v456_v24  ;;  %v469_v14 = vld [vmem:[%s3039_s5 + $0x3b0] sm:$0xff] }
  0x5d   : > { %v451_v26 = vld [vmem:[%s3039_s5 + $0x320] sm:$0xff]  ;;  %v452_v28 = vld [vmem:[%s3039_s5 + $0x328] sm:$0xff]  ;;  %581 = vmatpush.msra.mxu0 %v387_v25  ;;  %711 = vmatpush.msra.mxu2 %v388_v27  ;;  %v3132_v15 = vld [vmem:[#allocation3 + $0x10] sm:$0xff] }
  0x5e   : > { %v383_v29 = vld [vmem:[%s3039_s5 + $0x100] sm:$0xff]  ;;  %646 = vmatpush.msra.mxu1 %v451_v26  ;;  %v384_v31 = vld [vmem:[%s3039_s5 + $0x108] sm:$0xff]  ;;  %776 = vmatpush.msra.mxu3 %v452_v28  ;;  %v3134_v16 = vld [vmem:[#allocation3 + $0x18] sm:$0xff] }
  0x5f   : > { %v447_v30 = vld [vmem:[%s3039_s5 + $0x300] sm:$0xff]  ;;  %v448_v32 = vld [vmem:[%s3039_s5 + $0x308] sm:$0xff]  ;;  %582 = vmatpush.msra.mxu0 %v383_v29  ;;  %712 = vmatpush.msra.mxu2 %v384_v31  ;;  %v402_v17 = vld [vmem:[%s3039_s5 + $0x198] sm:$0xff] }
  0x60   : > { %v379_v33 = vld [vmem:[%s3039_s5 + $0xe0] sm:$0xff]  ;;  %647 = vmatpush.msra.mxu1 %v447_v30  ;;  %v380_v35 = vld [vmem:[%s3039_s5 + $0xe8] sm:$0xff]  ;;  %777 = vmatpush.msra.mxu3 %v448_v32  ;;  %v466_v18 = vld [vmem:[%s3039_s5 + $0x398] sm:$0xff] }
  0x61   : > { %v443_v34 = vld [vmem:[%s3039_s5 + $0x2e0] sm:$0xff]  ;;  %v444_v36 = vld [vmem:[%s3039_s5 + $0x2e8] sm:$0xff]  ;;  %583 = vmatpush.msra.mxu0 %v379_v33  ;;  %713 = vmatpush.msra.mxu2 %v380_v35  ;;  %v401_v19 = vld [vmem:[%s3039_s5 + $0x190] sm:$0xff] }
  0x62   : > { %v375_v37 = vld [vmem:[%s3039_s5 + $0xc0] sm:$0xff]  ;;  %648 = vmatpush.msra.mxu1 %v443_v34  ;;  %v376_v39 = vld [vmem:[%s3039_s5 + $0xc8] sm:$0xff]  ;;  %778 = vmatpush.msra.mxu3 %v444_v36  ;;  %v465_v20 = vld [vmem:[%s3039_s5 + $0x390] sm:$0xff] }
  0x63   : > { %v439_v38 = vld [vmem:[%s3039_s5 + $0x2c0] sm:$0xff]  ;;  %v440_v40 = vld [vmem:[%s3039_s5 + $0x2c8] sm:$0xff]  ;;  %584 = vmatpush.msra.mxu0 %v375_v37  ;;  %714 = vmatpush.msra.mxu2 %v376_v39  ;;  %v398_v21 = vld [vmem:[%s3039_s5 + $0x178] sm:$0xff] }
  0x64   : > { %v371_v41 = vld [vmem:[%s3039_s5 + $0xa0] sm:$0xff]  ;;  %649 = vmatpush.msra.mxu1 %v439_v38  ;;  %v372_v43 = vld [vmem:[%s3039_s5 + $0xa8] sm:$0xff]  ;;  %779 = vmatpush.msra.mxu3 %v440_v40  ;;  %v462_v22 = vld [vmem:[%s3039_s5 + $0x378] sm:$0xff] }
  0x65   : > { %v435_v42 = vld [vmem:[%s3039_s5 + $0x2a0] sm:$0xff]  ;;  %v436_v44 = vld [vmem:[%s3039_s5 + $0x2a8] sm:$0xff]  ;;  %585 = vmatpush.msra.mxu0 %v371_v41  ;;  %715 = vmatpush.msra.mxu2 %v372_v43  ;;  %v397_v23 = vld [vmem:[%s3039_s5 + $0x170] sm:$0xff] }
  0x66   : > { %v367_v45 = vld [vmem:[%s3039_s5 + $0x80] sm:$0xff]  ;;  %650 = vmatpush.msra.mxu1 %v435_v42  ;;  %v368_v47 = vld [vmem:[%s3039_s5 + $0x88] sm:$0xff]  ;;  %780 = vmatpush.msra.mxu3 %v436_v44  ;;  %v461_v24 = vld [vmem:[%s3039_s5 + $0x370] sm:$0xff] }
  0x67   : > { %v431_v46 = vld [vmem:[%s3039_s5 + $0x280] sm:$0xff]  ;;  %v432_v48 = vld [vmem:[%s3039_s5 + $0x288] sm:$0xff]  ;;  %586 = vmatpush.msra.mxu0 %v367_v45  ;;  %716 = vmatpush.msra.mxu2 %v368_v47  ;;  %v394_v25 = vld [vmem:[%s3039_s5 + $0x158] sm:$0xff] }
  0x68   : > { %v363_v49 = vld [vmem:[%s3039_s5 + $0x60] sm:$0xff]  ;;  %651 = vmatpush.msra.mxu1 %v431_v46  ;;  %v364_v51 = vld [vmem:[%s3039_s5 + $0x68] sm:$0xff]  ;;  %781 = vmatpush.msra.mxu3 %v432_v48  ;;  %v458_v26 = vld [vmem:[%s3039_s5 + $0x358] sm:$0xff] }
  0x69   : > { %v427_v50 = vld [vmem:[%s3039_s5 + $0x260] sm:$0xff]  ;;  %v428_v52 = vld [vmem:[%s3039_s5 + $0x268] sm:$0xff]  ;;  %587 = vmatpush.msra.mxu0 %v363_v49  ;;  %717 = vmatpush.msra.mxu2 %v364_v51  ;;  %v393_v27 = vld [vmem:[%s3039_s5 + $0x150] sm:$0xff] }
  0x6a   : > { %v359_v53 = vld [vmem:[%s3039_s5 + $0x40] sm:$0xff]  ;;  %652 = vmatpush.msra.mxu1 %v427_v50  ;;  %v360_v55 = vld [vmem:[%s3039_s5 + $0x48] sm:$0xff]  ;;  %782 = vmatpush.msra.mxu3 %v428_v52  ;;  %v457_v28 = vld [vmem:[%s3039_s5 + $0x350] sm:$0xff] }
  0x6b   : > { %v423_v54 = vld [vmem:[%s3039_s5 + $0x240] sm:$0xff]  ;;  %v424_v56 = vld [vmem:[%s3039_s5 + $0x248] sm:$0xff]  ;;  %588 = vmatpush.msra.mxu0 %v359_v53  ;;  %718 = vmatpush.msra.mxu2 %v360_v55  ;;  %v390_v31 = vld [vmem:[%s3039_s5 + $0x138] sm:$0xff] }
  0x6c   : > { %v355_v57 = vld [vmem:[%s3039_s5 + $0x20] sm:$0xff]  ;;  %653 = vmatpush.msra.mxu1 %v423_v54  ;;  %v356_v59 = vld [vmem:[%s3039_s5 + $0x28] sm:$0xff]  ;;  %783 = vmatpush.msra.mxu3 %v424_v56  ;;  %v454_v32 = vld [vmem:[%s3039_s5 + $0x338] sm:$0xff] }
  0x6d   : > { %v419_v58 = vld [vmem:[%s3039_s5 + $0x220] sm:$0xff]  ;;  %v420_v60 = vld [vmem:[%s3039_s5 + $0x228] sm:$0xff]  ;;  %589 = vmatpush.msra.mxu0 %v355_v57  ;;  %719 = vmatpush.msra.mxu2 %v356_v59  ;;  %v389_v33 = vld [vmem:[%s3039_s5 + $0x130] sm:$0xff] }
  0x6e   : > { %v351_v61 = vld [vmem:[%s3039_s5] sm:$0xff]  ;;  %654 = vmatpush.msra.mxu1 %v419_v58  ;;  %v352_v63 = vld [vmem:[%s3039_s5 + $0x8] sm:$0xff]  ;;  %784 = vmatpush.msra.mxu3 %v420_v60  ;;  %v453_v34 = vld [vmem:[%s3039_s5 + $0x330] sm:$0xff] }
  0x6f   : > { %v415_v62 = vld [vmem:[%s3039_s5 + $0x200] sm:$0xff]  ;;  %v416_v0 = vld [vmem:[%s3039_s5 + $0x208] sm:$0xff]  ;;  %590 = vmatpush.msra.mxu0 %v351_v61  ;;  %720 = vmatpush.msra.mxu2 %v352_v63  ;;  %v3164_v35 = vld [vmem:[#allocation3 + $0x30] sm:$0xff] }
  0x70   : > { %v3112_v1 = vld [vmem:[#allocation3] sm:$0xff]  ;;  %v3114_v2 = vld [vmem:[#allocation3 + $0x8] sm:$0xff]  ;;  %655 = vmatpush.msra.mxu1 %v415_v62  ;;  %785 = vmatpush.msra.mxu3 %v416_v0  ;;  %v3166_v36 = vld [vmem:[#allocation3 + $0x38] sm:$0xff] }
  0x71   : > { %591 = vmatmul.f32.vlgmr.msra.gmra.mxu0 %v3112_v1  ;;  %656 = vmatmul.f32.vlgmr.msra.gmra.mxu1 %v3114_v2  ;;  %v3152_v29 = vld [vmem:[#allocation3 + $0x20] sm:$0xff]  ;;  %v3154_v30 = vld [vmem:[#allocation3 + $0x28] sm:$0xff]  ;;  %v386_v37 = vld [vmem:[%s3039_s5 + $0x118] sm:$0xff] }
  0x72   : > { %721 = vmatmul.f32.vlgmr.msra.gmra.mxu2 %v3112_v1  ;;  %786 = vmatmul.f32.vlgmr.msra.gmra.mxu3 %v3114_v2  ;;  %v450_v38 = vld [vmem:[%s3039_s5 + $0x318] sm:$0xff]  ;;  %v385_v39 = vld [vmem:[%s3039_s5 + $0x110] sm:$0xff]  ;;  %v3176_v41 = vld [vmem:[#allocation3 + $0x40] sm:$0xff] }
  0x73   : > { %965 = vmatpush.msrb.mxu2 %v414_v3  ;;  %1030 = vmatpush.msrb.mxu3 %v478_v4  ;;  %v449_v40 = vld [vmem:[%s3039_s5 + $0x310] sm:$0xff]  ;;  %v3178_v42 = vld [vmem:[#allocation3 + $0x48] sm:$0xff]  ;;  %v382_v43 = vld [vmem:[%s3039_s5 + $0xf8] sm:$0xff] }
  0x74   : > { %835 = vmatpush.msrb.mxu0 %v413_v5  ;;  %900 = vmatpush.msrb.mxu1 %v477_v6  ;;  %v446_v44 = vld [vmem:[%s3039_s5 + $0x2f8] sm:$0xff]  ;;  %v381_v45 = vld [vmem:[%s3039_s5 + $0xf0] sm:$0xff]  ;;  %v3200_v53 = vld [vmem:[#allocation3 + $0x60] sm:$0xff] }
  0x75   : > { %966 = vmatpush.msrb.mxu2 %v410_v7  ;;  %1031 = vmatpush.msrb.mxu3 %v474_v8  ;;  %v445_v46 = vld [vmem:[%s3039_s5 + $0x2f0] sm:$0xff]  ;;  %v3190_v48 = vld [vmem:[#allocation3 + $0x58] sm:$0xff]  ;;  %v3202_v54 = vld [vmem:[#allocation3 + $0x68] sm:$0xff] }
  0x76   : > { %836 = vmatpush.msrb.mxu0 %v409_v9  ;;  %901 = vmatpush.msrb.mxu1 %v473_v10  ;;  %v3188_v47 = vld [vmem:[#allocation3 + $0x50] sm:$0xff]  ;;  %v378_v49 = vld [vmem:[%s3039_s5 + $0xd8] sm:$0xff]  ;;  %v3224_v3 = vld [vmem:[#allocation3 + $0x80] sm:$0xff] }
  0x77   : > { %967 = vmatpush.msrb.mxu2 %v406_v11  ;;  %1032 = vmatpush.msrb.mxu3 %v470_v12  ;;  %v442_v50 = vld [vmem:[%s3039_s5 + $0x2d8] sm:$0xff]  ;;  %v377_v51 = vld [vmem:[%s3039_s5 + $0xd0] sm:$0xff]  ;;  %v3226_v4 = vld [vmem:[#allocation3 + $0x88] sm:$0xff] }
  0x78   : > { %837 = vmatpush.msrb.mxu0 %v405_v13  ;;  %902 = vmatpush.msrb.mxu1 %v469_v14  ;;  %v441_v52 = vld [vmem:[%s3039_s5 + $0x2d0] sm:$0xff]  ;;  %v374_v55 = vld [vmem:[%s3039_s5 + $0xb8] sm:$0xff] }
  0x79   : > { %594 = vmatmul.f32.gmra.mxu0 %v3132_v15  ;;  %659 = vmatmul.f32.gmra.mxu1 %v3134_v16  ;;  %v438_v56 = vld [vmem:[%s3039_s5 + $0x2b8] sm:$0xff]  ;;  %v373_v57 = vld [vmem:[%s3039_s5 + $0xb0] sm:$0xff] }
  0x7a   : > { %724 = vmatmul.f32.gmra.mxu2 %v3132_v15  ;;  %789 = vmatmul.f32.gmra.mxu3 %v3134_v16  ;;  %v437_v58 = vld [vmem:[%s3039_s5 + $0x2b0] sm:$0xff]  ;;  %v3214_v60 = vld [vmem:[#allocation3 + $0x78] sm:$0xff] }
  0x7b   : > { %968 = vmatpush.msrb.mxu2 %v402_v17  ;;  %1033 = vmatpush.msrb.mxu3 %v466_v18  ;;  %v3212_v59 = vld [vmem:[#allocation3 + $0x70] sm:$0xff]  ;;  %v370_v61 = vld [vmem:[%s3039_s5 + $0x98] sm:$0xff]  ;;  %v3248_v17 = vld [vmem:[#allocation3 + $0xa0] sm:$0xff] }
  0x7c   : > { %838 = vmatpush.msrb.mxu0 %v401_v19  ;;  %903 = vmatpush.msrb.mxu1 %v465_v20  ;;  %v434_v62 = vld [vmem:[%s3039_s5 + $0x298] sm:$0xff]  ;;  %v369_v63 = vld [vmem:[%s3039_s5 + $0x90] sm:$0xff]  ;;  %v3250_v18 = vld [vmem:[#allocation3 + $0xa8] sm:$0xff] }
  0x7d   : > { %969 = vmatpush.msrb.mxu2 %v398_v21  ;;  %1034 = vmatpush.msrb.mxu3 %v462_v22  ;;  %v433_v0 = vld [vmem:[%s3039_s5 + $0x290] sm:$0xff]  ;;  %v366_v5 = vld [vmem:[%s3039_s5 + $0x78] sm:$0xff] }
  0x7e   : > { %839 = vmatpush.msrb.mxu0 %v397_v23  ;;  %904 = vmatpush.msrb.mxu1 %v461_v24  ;;  %v430_v6 = vld [vmem:[%s3039_s5 + $0x278] sm:$0xff]  ;;  %v365_v7 = vld [vmem:[%s3039_s5 + $0x70] sm:$0xff] }
  0x7f   : > { %970 = vmatpush.msrb.mxu2 %v394_v25  ;;  %1035 = vmatpush.msrb.mxu3 %v458_v26  ;;  %v429_v8 = vld [vmem:[%s3039_s5 + $0x270] sm:$0xff]  ;;  %v3238_v10 = vld [vmem:[#allocation3 + $0x98] sm:$0xff] }
  0x80   : > { %840 = vmatpush.msrb.mxu0 %v393_v27  ;;  %905 = vmatpush.msrb.mxu1 %v457_v28  ;;  %v3236_v9 = vld [vmem:[#allocation3 + $0x90] sm:$0xff]  ;;  %v362_v11 = vld [vmem:[%s3039_s5 + $0x58] sm:$0xff]  ;;  %v3270_v27 = vld [vmem:[#allocation3 + $0xc0] sm:$0xff] }
  0x81   : > { %597 = vmatmul.f32.gmra.mxu0 %v3152_v29  ;;  %662 = vmatmul.f32.gmra.mxu1 %v3154_v30  ;;  %v426_v12 = vld [vmem:[%s3039_s5 + $0x258] sm:$0xff]  ;;  %v361_v13 = vld [vmem:[%s3039_s5 + $0x50] sm:$0xff]  ;;  %v3272_v28 = vld [vmem:[#allocation3 + $0xc8] sm:$0xff] }
  0x82   : > { %727 = vmatmul.f32.gmra.mxu2 %v3152_v29  ;;  %792 = vmatmul.f32.gmra.mxu3 %v3154_v30  ;;  %v425_v14 = vld [vmem:[%s3039_s5 + $0x250] sm:$0xff]  ;;  %v358_v19 = vld [vmem:[%s3039_s5 + $0x38] sm:$0xff] }
  0x83   : > { %971 = vmatpush.msrb.mxu2 %v390_v31  ;;  %1036 = vmatpush.msrb.mxu3 %v454_v32  ;;  %v422_v20 = vld [vmem:[%s3039_s5 + $0x238] sm:$0xff]  ;;  %v357_v21 = vld [vmem:[%s3039_s5 + $0x30] sm:$0xff] }
  0x84   : > { %841 = vmatpush.msrb.mxu0 %v389_v33  ;;  %906 = vmatpush.msrb.mxu1 %v453_v34  ;;  %v421_v22 = vld [vmem:[%s3039_s5 + $0x230] sm:$0xff]  ;;  %v3262_v24 = vld [vmem:[#allocation3 + $0xb8] sm:$0xff] }
  0x85   : > { %972 = vmatpush.msrb.mxu2 %v386_v37  ;;  %1037 = vmatpush.msrb.mxu3 %v450_v38  ;;  %v3260_v23 = vld [vmem:[#allocation3 + $0xb0] sm:$0xff]  ;;  %v354_v25 = vld [vmem:[%s3039_s5 + $0x18] sm:$0xff]  ;;  %v3288_v37 = vld [vmem:[#allocation3 + $0xe0] sm:$0xff] }
  0x86   : > { %842 = vmatpush.msrb.mxu0 %v385_v39  ;;  %907 = vmatpush.msrb.mxu1 %v449_v40  ;;  %v418_v26 = vld [vmem:[%s3039_s5 + $0x218] sm:$0xff]  ;;  %v353_v31 = vld [vmem:[%s3039_s5 + $0x10] sm:$0xff]  ;;  %v3290_v38 = vld [vmem:[#allocation3 + $0xe8] sm:$0xff] }
  0x87   : > { %973 = vmatpush.msrb.mxu2 %v382_v43  ;;  %1038 = vmatpush.msrb.mxu3 %v446_v44  ;;  %v417_v32 = vld [vmem:[%s3039_s5 + $0x210] sm:$0xff]  ;;  %v3282_v34 = vld [vmem:[#allocation3 + $0xd8] sm:$0xff] }
  0x88   : > { %843 = vmatpush.msrb.mxu0 %v381_v45  ;;  %908 = vmatpush.msrb.mxu1 %v445_v46  ;;  %v3280_v33 = vld [vmem:[#allocation3 + $0xd0] sm:$0xff]  ;;  %v3298_v40 = vld [vmem:[#allocation3 + $0xf8] sm:$0xff] }
  0x89   : > { %600 = vmatmul.f32.gmra.mxu0 %v3164_v35  ;;  %665 = vmatmul.f32.gmra.mxu1 %v3166_v36  ;;  %v3296_v39 = vld [vmem:[#allocation3 + $0xf0] sm:$0xff] }
  0x8a   : > { %730 = vmatmul.f32.gmra.mxu2 %v3164_v35  ;;  %795 = vmatmul.f32.gmra.mxu3 %v3166_v36 }
  0x8b   : > { %974 = vmatpush.msrb.mxu2 %v378_v49  ;;  %1039 = vmatpush.msrb.mxu3 %v442_v50  ;;  %v510_v49 = vld [vmem:[%s3045_s11 + $0xf8] sm:$0xff] }
  0x8c   : > { %844 = vmatpush.msrb.mxu0 %v377_v51  ;;  %909 = vmatpush.msrb.mxu1 %v441_v52  ;;  %v542_v50 = vld [vmem:[%s3045_s11 + $0x1f8] sm:$0xff] }
  0x8d   : > { %975 = vmatpush.msrb.mxu2 %v374_v55  ;;  %1040 = vmatpush.msrb.mxu3 %v438_v56 }
  0x8e   : > { %845 = vmatpush.msrb.mxu0 %v373_v57  ;;  %910 = vmatpush.msrb.mxu1 %v437_v58 }
  0x8f   : > { %976 = vmatpush.msrb.mxu2 %v370_v61  ;;  %1041 = vmatpush.msrb.mxu3 %v434_v62  ;;  %v509_v61 = vld [vmem:[%s3045_s11 + $0xf0] sm:$0xff] }
  0x90   : > { %846 = vmatpush.msrb.mxu0 %v369_v63  ;;  %911 = vmatpush.msrb.mxu1 %v433_v0  ;;  %v541_v62 = vld [vmem:[%s3045_s11 + $0x1f0] sm:$0xff]  ;;  %v508_v63 = vld [vmem:[%s3045_s11 + $0xe8] sm:$0xff] }
  0x91   : > { %603 = vmatmul.f32.gmra.mxu0 %v3176_v41  ;;  %668 = vmatmul.f32.gmra.mxu1 %v3178_v42  ;;  %v540_v0 = vld [vmem:[%s3045_s11 + $0x1e8] sm:$0xff] }
  0x92   : > { %733 = vmatmul.f32.gmra.mxu2 %v3176_v41  ;;  %798 = vmatmul.f32.gmra.mxu3 %v3178_v42 }
  0x93   : > { %977 = vmatpush.msrb.mxu2 %v366_v5  ;;  %1042 = vmatpush.msrb.mxu3 %v430_v6 }
  0x94   : > { %847 = vmatpush.msrb.mxu0 %v365_v7  ;;  %912 = vmatpush.msrb.mxu1 %v429_v8  ;;  %v507_v8 = vld [vmem:[%s3045_s11 + $0xe0] sm:$0xff] }
  0x95   : > { %978 = vmatpush.msrb.mxu2 %v362_v11  ;;  %1043 = vmatpush.msrb.mxu3 %v426_v12  ;;  %v539_v11 = vld [vmem:[%s3045_s11 + $0x1e0] sm:$0xff]  ;;  %v506_v12 = vld [vmem:[%s3045_s11 + $0xd8] sm:$0xff] }
  0x96   : > { %848 = vmatpush.msrb.mxu0 %v361_v13  ;;  %913 = vmatpush.msrb.mxu1 %v425_v14  ;;  %v538_v13 = vld [vmem:[%s3045_s11 + $0x1d8] sm:$0xff] }
  0x97   : > { %979 = vmatpush.msrb.mxu2 %v358_v19  ;;  %1044 = vmatpush.msrb.mxu3 %v422_v20 }
  0x98   : > { %849 = vmatpush.msrb.mxu0 %v357_v21  ;;  %914 = vmatpush.msrb.mxu1 %v421_v22 }
  0x99   : > { %606 = vmatmul.f32.gmra.mxu0 %v3188_v47  ;;  %671 = vmatmul.f32.gmra.mxu1 %v3190_v48 }
  0x9a   : > { %736 = vmatmul.f32.gmra.mxu2 %v3188_v47  ;;  %801 = vmatmul.f32.gmra.mxu3 %v3190_v48 }
  0x9b   : > { %980 = vmatpush.msrb.mxu2 %v354_v25  ;;  %1045 = vmatpush.msrb.mxu3 %v418_v26  ;;  %v504_v25 = vld [vmem:[%s3045_s11 + $0xc8] sm:$0xff] }
  0x9c   : > { %850 = vmatpush.msrb.mxu0 %v353_v31  ;;  %915 = vmatpush.msrb.mxu1 %v417_v32  ;;  %v536_v26 = vld [vmem:[%s3045_s11 + $0x1c8] sm:$0xff] }
  0x9d   : > { %1929 = vmatpush.msra.mxu2 %v510_v49  ;;  %1994 = vmatpush.msra.mxu3 %v542_v50  ;;  %v535_v49 = vld [vmem:[%s3045_s11 + $0x1c0] sm:$0xff]  ;;  %v502_v50 = vld [vmem:[%s3045_s11 + $0xb8] sm:$0xff] }
  0x9e   : > { %1799 = vmatpush.msra.mxu0 %v509_v61  ;;  %1864 = vmatpush.msra.mxu1 %v541_v62  ;;  %v534_v61 = vld [vmem:[%s3045_s11 + $0x1b8] sm:$0xff]  ;;  %v533_v62 = vld [vmem:[%s3045_s11 + $0x1b0] sm:$0xff] }
  0x9f   : > { %1930 = vmatpush.msra.mxu2 %v508_v63  ;;  %1995 = vmatpush.msra.mxu3 %v540_v0  ;;  %v500_v63 = vld [vmem:[%s3045_s11 + $0xa8] sm:$0xff] }
  0xa0   : > { %1800 = vmatpush.msra.mxu0 %v507_v8  ;;  %1865 = vmatpush.msra.mxu1 %v539_v11 }
  0xa1   : > { %609 = vmatmul.f32.gmra.mxu0 %v3200_v53  ;;  %674 = vmatmul.f32.gmra.mxu1 %v3202_v54 }
  0xa2   : > { %739 = vmatmul.f32.gmra.mxu2 %v3200_v53  ;;  %804 = vmatmul.f32.gmra.mxu3 %v3202_v54 }
  0xa3   : > { %1931 = vmatpush.msra.mxu2 %v506_v12  ;;  %1996 = vmatpush.msra.mxu3 %v538_v13 }
  0xa5   : > { %1932 = vmatpush.msra.mxu2 %v504_v25  ;;  %1997 = vmatpush.msra.mxu3 %v536_v26 }
  0xa7   : > { %1933 = vmatpush.msra.mxu2 %v502_v50  ;;  %1998 = vmatpush.msra.mxu3 %v534_v61 }
  0xa9   : > { %612 = vmatmul.f32.gmra.mxu0 %v3212_v59  ;;  %677 = vmatmul.f32.gmra.mxu1 %v3214_v60 }
  0xaa   : > { %742 = vmatmul.f32.gmra.mxu2 %v3212_v59  ;;  %807 = vmatmul.f32.gmra.mxu3 %v3214_v60 }
  0xab   : > { %1934 = vmatpush.msra.mxu2 %v500_v63  ;;  %v527_v63 = vld [vmem:[%s3045_s11 + $0x180] sm:$0xff] }
  0xb1   : > { %615 = vmatmul.f32.gmra.mxu0 %v3224_v3  ;;  %680 = vmatmul.f32.gmra.mxu1 %v3226_v4 }
  0xb2   : > { %745 = vmatmul.f32.gmra.mxu2 %v3224_v3  ;;  %810 = vmatmul.f32.gmra.mxu3 %v3226_v4 }
  0xb9   : > { %618 = vmatmul.f32.gmra.mxu0 %v3236_v9  ;;  %683 = vmatmul.f32.gmra.mxu1 %v3238_v10 }
  0xba   : > { %748 = vmatmul.f32.gmra.mxu2 %v3236_v9  ;;  %813 = vmatmul.f32.gmra.mxu3 %v3238_v10 }
  0xc1   : > { %621 = vmatmul.f32.gmra.mxu0 %v3248_v17  ;;  %686 = vmatmul.f32.gmra.mxu1 %v3250_v18 }
  0xc2   : > { %751 = vmatmul.f32.gmra.mxu2 %v3248_v17  ;;  %816 = vmatmul.f32.gmra.mxu3 %v3250_v18 }
  0xc9   : > { %624 = vmatmul.f32.gmra.mxu0 %v3260_v23  ;;  %689 = vmatmul.f32.gmra.mxu1 %v3262_v24 }
  0xca   : > { %754 = vmatmul.f32.gmra.mxu2 %v3260_v23  ;;  %819 = vmatmul.f32.gmra.mxu3 %v3262_v24 }
  0xd1   : > { %627 = vmatmul.f32.gmra.mxu0 %v3270_v27  ;;  %692 = vmatmul.f32.gmra.mxu1 %v3272_v28 }
  0xd2   : > { %757 = vmatmul.f32.gmra.mxu2 %v3270_v27  ;;  %822 = vmatmul.f32.gmra.mxu3 %v3272_v28 }
  0xd9   : > { %630 = vmatmul.f32.gmra.mxu0 %v3280_v33  ;;  %695 = vmatmul.f32.gmra.mxu1 %v3282_v34 }
  0xda   : > { %760 = vmatmul.f32.gmra.mxu2 %v3280_v33  ;;  %825 = vmatmul.f32.gmra.mxu3 %v3282_v34 }
  0xe1   : > { %633 = vmatmul.f32.gmra.mxu0 %v3288_v37  ;;  %698 = vmatmul.f32.gmra.mxu1 %v3290_v38 }
  0xe2   : > { %763 = vmatmul.f32.gmra.mxu2 %v3288_v37  ;;  %828 = vmatmul.f32.gmra.mxu3 %v3290_v38 }
  0xe9   : > { %636 = vmatmul.f32.gmra.mxu0 %v3296_v39  ;;  %701 = vmatmul.f32.gmra.mxu1 %v3298_v40 }
  0xea   : > { %766 = vmatmul.f32.gmra.mxu2 %v3296_v39  ;;  %831 = vmatmul.f32.gmra.mxu3 %v3298_v40 }
  0xee   : > { %v3304_v43 = vpop.f32.mrf.mxu0  ;;  %v3306_v44 = vpop.f32.mrf.mxu1 }
  0xf1   : > { %851 = vmatmul.f32.vlgmr.msrb.gmra.mxu0 %v3112_v1  ;;  %916 = vmatmul.f32.vlgmr.msrb.gmra.mxu1 %v3114_v2 }
  0xf2   : > { %981 = vmatmul.f32.vlgmr.msrb.gmra.mxu2 %v3112_v1  ;;  %1046 = vmatmul.f32.vlgmr.msrb.gmra.mxu3 %v3114_v2 }
  0xf5   : > { %v722_v45 = vpop.f32.mrf.mxu2  ;;  %v787_v46 = vpop.f32.mrf.mxu3 }
  0xf6   : > { %v3314_v51 = vadd.f32 %v787_v46, %v722_v45  ;;  %v3316_v52 = vpop.f32.mrf.mxu0  ;;  %v3318_v55 = vpop.f32.mrf.mxu1  ;;  %v503_v46 = vld [vmem:[%s3045_s11 + $0xc0] sm:$0xff] }
  0xf9   : > { %854 = vmatmul.f32.gmra.mxu0 %v3132_v15  ;;  %919 = vmatmul.f32.gmra.mxu1 %v3134_v16 }
  0xfa   : > { %984 = vmatmul.f32.gmra.mxu2 %v3132_v15  ;;  %1049 = vmatmul.f32.gmra.mxu3 %v3134_v16 }
  0xfd   : > { %v725_v1 = vpop.f32.mrf.mxu2  ;;  %v790_v2 = vpop.f32.mrf.mxu3 }
  0xfe   : > { %v3324_v56 = vadd.f32 %v790_v2, %v725_v1  ;;  %v3326_v57 = vpop.f32.mrf.mxu0  ;;  %v3328_v58 = vpop.f32.mrf.mxu1 }
 0x101   : > { %857 = vmatmul.f32.gmra.mxu0 %v3152_v29  ;;  %922 = vmatmul.f32.gmra.mxu1 %v3154_v30 }
 0x102   : > { %987 = vmatmul.f32.gmra.mxu2 %v3152_v29  ;;  %1052 = vmatmul.f32.gmra.mxu3 %v3154_v30 }
 0x105   : > { %v728_v15 = vpop.f32.mrf.mxu2  ;;  %v793_v16 = vpop.f32.mrf.mxu3 }
 0x106   : > { %v3338_v5 = vadd.f32 %v793_v16, %v728_v15  ;;  %v3340_v6 = vpop.f32.mrf.mxu0  ;;  %v3342_v7 = vpop.f32.mrf.mxu1  ;;  %v532_v16 = vld [vmem:[%s3045_s11 + $0x1a8] sm:$0xff] }
 0x107   : > { %1999 = vmatpush.msra.mxu3 %v532_v16 }
 0x109   : > { %860 = vmatmul.f32.gmra.mxu0 %v3164_v35  ;;  %925 = vmatmul.f32.gmra.mxu1 %v3166_v36 }
 0x10a   : > { %990 = vmatmul.f32.gmra.mxu2 %v3164_v35  ;;  %1055 = vmatmul.f32.gmra.mxu3 %v3166_v36  ;;  %v505_v35 = vld [vmem:[%s3045_s11 + $0xd0] sm:$0xff] }
 0x10b   : > { %v537_v36 = vld [vmem:[%s3045_s11 + $0x1d0] sm:$0xff]  ;;  %1801 = vmatpush.msra.mxu0 %v505_v35  ;;  %v499_v35 = vld [vmem:[%s3045_s11 + $0xa0] sm:$0xff] }
 0x10c   : > { %1866 = vmatpush.msra.mxu1 %v537_v36  ;;  %v498_v36 = vld [vmem:[%s3045_s11 + $0x98] sm:$0xff] }
 0x10d   : > { %v731_v29 = vpop.f32.mrf.mxu2  ;;  %v796_v30 = vpop.f32.mrf.mxu3  ;;  %1802 = vmatpush.msra.mxu0 %v503_v46  ;;  %1935 = vmatpush.msra.mxu2 %v498_v36  ;;  %v2462_v36 = vmul.f32 -1.442695, %v3314_v51 }
 0x10e   : > { %v3352_v14 = vadd.f32 %v796_v30, %v731_v29  ;;  %v3354_v19 = vpop.f32.mrf.mxu0  ;;  %v3356_v20 = vpop.f32.mrf.mxu1  ;;  %1867 = vmatpush.msra.mxu1 %v535_v49 }
 0x110   : > { %1868 = vmatpush.msra.mxu1 %v533_v62  ;;  %v495_v62 = vld [vmem:[%s3045_s11 + $0x80] sm:$0xff] }
 0x111   : > { %863 = vmatmul.f32.gmra.mxu0 %v3176_v41  ;;  %928 = vmatmul.f32.gmra.mxu1 %v3178_v42 }
 0x112   : > { %993 = vmatmul.f32.gmra.mxu2 %v3176_v41  ;;  %1058 = vmatmul.f32.gmra.mxu3 %v3178_v42 }
 0x115   : > { %v734_v21 = vpop.f32.mrf.mxu2  ;;  %v799_v22 = vpop.f32.mrf.mxu3 }
 0x116   : > { %v3366_v31 = vpop.f32.mrf.mxu0  ;;  %v3368_v32 = vpop.f32.mrf.mxu1  ;;  %v3370_v41 = vadd.f32 %v799_v22, %v734_v21 }
 0x118   : > { %4873 = vst [vmem:[#allocation13_spill] sm:$0xff] %v3370_v41 }
 0x119   : > { %866 = vmatmul.f32.gmra.mxu0 %v3188_v47  ;;  %931 = vmatmul.f32.gmra.mxu1 %v3190_v48 }
 0x11a   : > { %996 = vmatmul.f32.gmra.mxu2 %v3188_v47  ;;  %1061 = vmatmul.f32.gmra.mxu3 %v3190_v48  ;;  %v501_v48 = vld [vmem:[%s3045_s11 + $0xb0] sm:$0xff] }
 0x11b   : > { %1803 = vmatpush.msra.mxu0 %v501_v48  ;;  %v3444_v48 = vadd.f32 %v3306_v44, %v3304_v43 }
 0x11d   : > { %v737_v42 = vpop.f32.mrf.mxu2  ;;  %v802_v45 = vpop.f32.mrf.mxu3  ;;  %1804 = vmatpush.msra.mxu0 %v499_v35  ;;  %v492_v35 = vld [vmem:[%s3045_s11 + $0x68] sm:$0xff] }
 0x11e   : > { %v3379_v1 = vpop.f32.mrf.mxu0  ;;  %v3381_v2 = vpop.f32.mrf.mxu1  ;;  %v3384_v47 = vadd.f32 %v802_v45, %v737_v42  ;;  %v497_v42 = vld [vmem:[%s3045_s11 + $0x90] sm:$0xff] }
 0x11f   : > { %v529_v45 = vld [vmem:[%s3045_s11 + $0x190] sm:$0xff]  ;;  %1805 = vmatpush.msra.mxu0 %v497_v42 }
 0x120   : > { %4874 = vst [vmem:[#allocation14_spill] sm:$0xff] %v3384_v47 }
 0x121   : > { %869 = vmatmul.f32.gmra.mxu0 %v3200_v53  ;;  %934 = vmatmul.f32.gmra.mxu1 %v3202_v54 }
 0x122   : > { %999 = vmatmul.f32.gmra.mxu2 %v3200_v53  ;;  %1064 = vmatmul.f32.gmra.mxu3 %v3202_v54 }
 0x123   : > { %1806 = vmatpush.msra.mxu0 %v495_v62 }
 0x125   : > { %v740_v0 = vpop.f32.mrf.mxu2  ;;  %v805_v15 = vpop.f32.mrf.mxu3 }
 0x126   : > { %v3394_v8 = vpop.f32.mrf.mxu0  ;;  %v3396_v11 = vpop.f32.mrf.mxu1  ;;  %v3398_v53 = vadd.f32 %v805_v15, %v740_v0  ;;  %v494_v0 = vld [vmem:[%s3045_s11 + $0x78] sm:$0xff] }
 0x128   : > { %4875 = vst [vmem:[#allocation15_spill] sm:$0xff] %v3398_v53 }
 0x129   : > { %872 = vmatmul.f32.gmra.mxu0 %v3212_v59  ;;  %937 = vmatmul.f32.gmra.mxu1 %v3214_v60 }
 0x12a   : > { %1002 = vmatmul.f32.gmra.mxu2 %v3212_v59  ;;  %1067 = vmatmul.f32.gmra.mxu3 %v3214_v60  ;;  %v531_v59 = vld [vmem:[%s3045_s11 + $0x1a0] sm:$0xff]  ;;  %v530_v60 = vld [vmem:[%s3045_s11 + $0x198] sm:$0xff] }
 0x12b   : > { %1869 = vmatpush.msra.mxu1 %v531_v59  ;;  %2000 = vmatpush.msra.mxu3 %v530_v60  ;;  %v524_v59 = vld [vmem:[%s3045_s11 + $0x168] sm:$0xff] }
 0x12d   : > { %v743_v54 = vpop.f32.mrf.mxu2  ;;  %v808_v12 = vpop.f32.mrf.mxu3  ;;  %1870 = vmatpush.msra.mxu1 %v529_v45 }
 0x12e   : > { %v3404_v13 = vpop.f32.mrf.mxu0  ;;  %v3406_v29 = vpop.f32.mrf.mxu1  ;;  %v3408_v30 = vadd.f32 %v808_v12, %v743_v54  ;;  %v493_v54 = vld [vmem:[%s3045_s11 + $0x70] sm:$0xff] }
 0x12f   : > { %1871 = vmatpush.msra.mxu1 %v527_v63  ;;  %v525_v12 = vld [vmem:[%s3045_s11 + $0x170] sm:$0xff]  ;;  %1807 = vmatpush.msra.mxu0 %v493_v54  ;;  %v523_v63 = vld [vmem:[%s3045_s11 + $0x160] sm:$0xff] }
 0x131   : > { %875 = vmatmul.f32.gmra.mxu0 %v3224_v3  ;;  %940 = vmatmul.f32.gmra.mxu1 %v3226_v4 }
 0x132   : > { %1005 = vmatmul.f32.gmra.mxu2 %v3224_v3  ;;  %1070 = vmatmul.f32.gmra.mxu3 %v3226_v4  ;;  %v496_v3 = vld [vmem:[%s3045_s11 + $0x88] sm:$0xff] }
 0x133   : > { %v528_v4 = vld [vmem:[%s3045_s11 + $0x188] sm:$0xff]  ;;  %1936 = vmatpush.msra.mxu2 %v496_v3  ;;  %1872 = vmatpush.msra.mxu1 %v525_v12 }
 0x134   : > { %2001 = vmatpush.msra.mxu3 %v528_v4  ;;  %v2464_v4 = vmul.f32 -1.442695, %v3324_v56 }
 0x135   : > { %v3418_v21 = vpop.f32.mrf.mxu2  ;;  %v3420_v22 = vpop.f32.mrf.mxu3  ;;  %1937 = vmatpush.msra.mxu2 %v494_v0  ;;  %v490_v0 = vld [vmem:[%s3045_s11 + $0x58] sm:$0xff]  ;;  %1873 = vmatpush.msra.mxu1 %v523_v63  ;;  %v487_v63 = vld [vmem:[%s3045_s11 + $0x40] sm:$0xff] }
 0x136   : > { %v3422_v25 = vpop.f32.mrf.mxu0  ;;  %v3424_v26 = vpop.f32.mrf.mxu1 }
 0x137   : > { %1938 = vmatpush.msra.mxu2 %v492_v35 }
 0x139   : > { %878 = vmatmul.f32.gmra.mxu0 %v3236_v9  ;;  %943 = vmatmul.f32.gmra.mxu1 %v3238_v10 }
 0x13a   : > { %1008 = vmatmul.f32.gmra.mxu2 %v3236_v9  ;;  %1073 = vmatmul.f32.gmra.mxu3 %v3238_v10  ;;  %v526_v9 = vld [vmem:[%s3045_s11 + $0x178] sm:$0xff]  ;;  %v2461_v10 = vmul.f32 -1.442695, %v3444_v48 }
 0x13b   : > { %2002 = vmatpush.msra.mxu3 %v526_v9  ;;  %1939 = vmatpush.msra.mxu2 %v490_v0  ;;  %v486_v0 = vld [vmem:[%s3045_s11 + $0x38] sm:$0xff] }
 0x13c   : > { %2588 = vpow2.f32 %v2461_v10 }
 0x13d   : > { %v3434_v46 = vpop.f32.mrf.mxu2  ;;  %v3436_v49 = vpop.f32.mrf.mxu3  ;;  %2003 = vmatpush.msra.mxu3 %v524_v59  ;;  %2590 = vpow2.f32 %v2462_v36  ;;  %v3515_v59 = vadd.f32 %v3342_v7, %v3340_v6 }
 0x13e   : > { %v3438_v50 = vpop.f32.mrf.mxu0  ;;  %v3440_v61 = vpop.f32.mrf.mxu1 }
 0x141   : > { %881 = vmatmul.f32.gmra.mxu0 %v3248_v17  ;;  %946 = vmatmul.f32.gmra.mxu1 %v3250_v18 }
 0x142   : > { %1011 = vmatmul.f32.gmra.mxu2 %v3248_v17  ;;  %1076 = vmatmul.f32.gmra.mxu3 %v3250_v18  ;;  %v3470_v17 = vadd.f32 %v3318_v55, %v3316_v52  ;;  %v2589_v55 = vpop.eup %2588 }
 0x143   : > { %v3485_v3 = vadd.f32 1.0, %v2589_v55  ;;  %v2591_v62 = vpop.eup %2590 }
 0x144   : > { %v2463_v18 = vmul.f32 -1.442695, %v3470_v17 }
 0x145   : > { %v3455_v43 = vpop.f32.mrf.mxu2  ;;  %v3457_v44 = vpop.f32.mrf.mxu3  ;;  %vm1228_vm0 = vweird.f32 %v3485_v3 }
 0x146   : > { %4876 = vst [vmem:[#allocation16_spill] sm:$0xff] %v3455_v43  ;;  %v3459_v15 = vpop.f32.mrf.mxu0  ;;  %v3461_v16 = vpop.f32.mrf.mxu1  ;;  %2592 = vpow2.f32 %v2463_v18  ;;  %v489_v18 = vld [vmem:[%s3045_s11 + $0x50] sm:$0xff] }
 0x147   : > { %4877 = vst [vmem:[#allocation17_spill] sm:$0xff] %v3457_v44  ;;  %2594 = vrcp.f32 %v3485_v3  ;;  %v3650_v44 = vadd.f32 %v3368_v32, %v3366_v31 }
 0x148   : > { %4878 = vst [vmem:[#allocation18_spill] sm:$0xff] %v3459_v15  ;;  %2596 = vpow2.f32 %v2464_v4 }
 0x149   : > { %4879 = vst [vmem:[#allocation19_spill] sm:$0xff] %v3461_v16  ;;  %884 = vmatmul.f32.gmra.mxu0 %v3260_v23  ;;  %949 = vmatmul.f32.gmra.mxu1 %v3262_v24 }
 0x14a   : > { %1014 = vmatmul.f32.gmra.mxu2 %v3260_v23  ;;  %1079 = vmatmul.f32.gmra.mxu3 %v3262_v24  ;;  %v3490_v23 = vadd.f32 %v3328_v58, %v3326_v57  ;;  %v491_v24 = vld [vmem:[%s3045_s11 + $0x60] sm:$0xff]  ;;  %v3504_v57 = vadd.f32 1.0, %v2591_v62  ;;  %v522_v58 = vld [vmem:[%s3045_s11 + $0x158] sm:$0xff]  ;;  %v2467_v62 = vmul.f32 -1.442695, %v3515_v59  ;;  %4902 = vst [vmem:[#allocation38_spill] sm:$0xff] %v3650_v44 }
 0x14b   : > { %1808 = vmatpush.msra.mxu0 %v491_v24  ;;  %2004 = vmatpush.msra.mxu3 %v522_v58  ;;  %v488_v24 = vld [vmem:[%s3045_s11 + $0x48] sm:$0xff] }
 0x14c   : > { %v2593_v35 = vpop.eup %2592  ;;  %2598 = vrcp.f32 %v3504_v57  ;;  %1940 = vmatpush.msra.mxu2 %v488_v24  ;;  %vm1243_vm4 = vweird.f32 %v3504_v57 }
 0x14d   : > { %v3477_v60 = vpop.f32.mrf.mxu2  ;;  %v3479_v52 = vpop.f32.mrf.mxu3  ;;  %v3518_v36 = vadd.f32 1.0, %v2593_v35  ;;  %1809 = vmatpush.msra.mxu0 %v489_v18 }
 0x14e   : > { %4880 = vst [vmem:[#allocation20_spill] sm:$0xff] %v3477_v60  ;;  %v3481_v42 = vpop.f32.mrf.mxu0  ;;  %v3483_v45 = vpop.f32.mrf.mxu1  ;;  %1941 = vmatpush.msra.mxu2 %v486_v0  ;;  %v2468_v0 = vmul.f32 -1.442695, %v3352_v14 }
 0x14f   : > { %4881 = vst [vmem:[#allocation21_spill] sm:$0xff] %v3479_v52  ;;  %v3521_v55 = vpop.eup %2594  ;;  %1810 = vmatpush.msra.mxu0 %v487_v63  ;;  %v484_v63 = vld [vmem:[%s3045_s11 + $0x28] sm:$0xff]  ;;  %vm1258_vm7 = vweird.f32 %v3518_v36 }
 0x150   : > { %4882 = vst [vmem:[#allocation22_spill] sm:$0xff] %v3481_v42  ;;  %v2597_v4 = vpop.eup %2596  ;;  %1942 = vmatpush.msra.mxu2 %v484_v63  ;;  %v482_v63 = vld [vmem:[%s3045_s11 + $0x18] sm:$0xff]  ;;  %vm1229_vm1 = vweird.f32 %v3521_v55 }
 0x151   : > { %4883 = vst [vmem:[#allocation23_spill] sm:$0xff] %v3483_v45  ;;  %887 = vmatmul.f32.gmra.mxu0 %v3270_v27  ;;  %952 = vmatmul.f32.gmra.mxu1 %v3272_v28  ;;  %v3543_v18 = vadd.f32 1.0, %v2597_v4  ;;  %vm3624_vm3 = vmor %vm1228_vm0, %vm1229_vm1 }
 0x152   : > { %1017 = vmatmul.f32.gmra.mxu2 %v3270_v27  ;;  %1082 = vmatmul.f32.gmra.mxu3 %v3272_v28  ;;  %v2465_v27 = vmul.f32 -1.442695, %v3490_v23  ;;  %v2466_v28 = vmul.f32 -1.442695, %v3338_v5  ;;  %v3545_v24 = vpop.eup %2598 }
 0x153   : > { %1943 = vmatpush.msra.mxu2 %v482_v63  ;;  %vm1244_vm5 = vweird.f32 %v3545_v24  ;;  %vm1273_vm11 = vweird.f32 %v3543_v18 }
 0x154   : > { %2600 = vpow2.f32 %v2465_v27  ;;  %v485_v27 = vld [vmem:[%s3045_s11 + $0x30] sm:$0xff]  ;;  %vm3676_vm10 = vmor %vm1243_vm4, %vm1244_vm5 }
 0x155   : > { %v3500_v9 = vpop.f32.mrf.mxu2  ;;  %v3502_v10 = vpop.f32.mrf.mxu3  ;;  %2602 = vpow2.f32 %v2466_v28  ;;  %v1224_v28 = vmul.f32 %v3521_v55, %v3485_v3  ;;  %1811 = vmatpush.msra.mxu0 %v485_v27  ;;  %v1239_v27 = vmul.f32 %v3545_v24, %v3504_v57 }
 0x156   : > { %4884 = vst [vmem:[#allocation24_spill] sm:$0xff] %v3500_v9  ;;  %v3507_v54 = vpop.f32.mrf.mxu0  ;;  %v3509_v12 = vpop.f32.mrf.mxu1  ;;  %2604 = vrcp.f32 %v3518_v36 }
 0x157   : > { %4885 = vst [vmem:[#allocation25_spill] sm:$0xff] %v3502_v10  ;;  %2606 = vpow2.f32 %v2467_v62  ;;  %v1225_v4 = vsub.f32 1.0, %v1224_v28 }
 0x158   : > { %4886 = vst [vmem:[#allocation26_spill] sm:$0xff] %v3507_v54  ;;  %2608 = vrcp.f32 %v3543_v18 }
 0x159   : > { %4887 = vst [vmem:[#allocation27_spill] sm:$0xff] %v3509_v12  ;;  %890 = vmatmul.f32.gmra.mxu0 %v3280_v33  ;;  %955 = vmatmul.f32.gmra.mxu1 %v3282_v34  ;;  %v517_v12 = vld [vmem:[%s3045_s11 + $0x130] sm:$0xff]  ;;  %2610 = vpow2.f32 %v2468_v0 }
 0x15a   : > { %1020 = vmatmul.f32.gmra.mxu2 %v3280_v33  ;;  %1085 = vmatmul.f32.gmra.mxu3 %v3282_v34  ;;  %v521_v33 = vld [vmem:[%s3045_s11 + $0x150] sm:$0xff]  ;;  %v520_v34 = vld [vmem:[%s3045_s11 + $0x148] sm:$0xff] }
 0x15b   : > { %1874 = vmatpush.msra.mxu1 %v521_v33  ;;  %2005 = vmatpush.msra.mxu3 %v520_v34  ;;  %v518_v34 = vld [vmem:[%s3045_s11 + $0x138] sm:$0xff] }
 0x15d   : > { %v3528_v6 = vpop.f32.mrf.mxu2  ;;  %v3530_v7 = vpop.f32.mrf.mxu3  ;;  %2006 = vmatpush.msra.mxu3 %v518_v34 }
 0x15e   : > { %4888 = vst [vmem:[#allocation28_spill] sm:$0xff] %v3528_v6  ;;  %v3536_v58 = vpop.f32.mrf.mxu0  ;;  %v3538_v35 = vpop.f32.mrf.mxu1  ;;  %v519_v6 = vld [vmem:[%s3045_s11 + $0x140] sm:$0xff] }
 0x15f   : > { %4889 = vst [vmem:[#allocation29_spill] sm:$0xff] %v3530_v7  ;;  %v2601_v7 = vpop.eup %2600  ;;  %1875 = vmatpush.msra.mxu1 %v519_v6 }
 0x160   : > { %4890 = vst [vmem:[#allocation30_spill] sm:$0xff] %v3536_v58  ;;  %v2603_v58 = vpop.eup %2602  ;;  %v3558_v33 = vadd.f32 1.0, %v2601_v7  ;;  %v516_v7 = vld [vmem:[%s3045_s11 + $0x128] sm:$0xff] }
 0x161   : > { %4891 = vst [vmem:[#allocation31_spill] sm:$0xff] %v3538_v35  ;;  %v483_v35 = vld [vmem:[%s3045_s11 + $0x20] sm:$0xff]  ;;  %v3554_v62 = vpop.eup %2604  ;;  %893 = vmatmul.f32.gmra.mxu0 %v3288_v37  ;;  %958 = vmatmul.f32.gmra.mxu1 %v3290_v38 }
 0x162   : > { %1812 = vmatpush.msra.mxu0 %v483_v35  ;;  %v3564_v35 = vadd.f32 1.0, %v2603_v58  ;;  %1876 = vmatpush.msra.mxu1 %v517_v12  ;;  %v2607_v54 = vpop.eup %2606  ;;  %v515_v58 = vld [vmem:[%s3045_s11 + $0x120] sm:$0xff]  ;;  %v1226_v12 = vmul.f32 %v3521_v55, %v1225_v4  ;;  %v1254_v34 = vmul.f32 %v3554_v62, %v3518_v36  ;;  %2612 = vrcp.f32 %v3558_v33 }
 0x163   : > { %1023 = vmatmul.f32.gmra.mxu2 %v3288_v37  ;;  %1088 = vmatmul.f32.gmra.mxu3 %v3290_v38  ;;  %v1240_v37 = vsub.f32 1.0, %v1239_v27  ;;  %v514_v38 = vld [vmem:[%s3045_s11 + $0x118] sm:$0xff]  ;;  %v1232_v4 = vand.u32 2147483647, %v3485_v3  ;;  %v3592_v0 = vadd.f32 1.0, %v2607_v54  ;;  %vm1259_vm8 = vweird.f32 %v3554_v62 }
 0x164   : > { %2007 = vmatpush.msra.mxu3 %v516_v7  ;;  %1877 = vmatpush.msra.mxu1 %v515_v58  ;;  %2614 = vrcp.f32 %v3564_v35  ;;  %v1227_v27 = vadd.f32 %v3521_v55, %v1226_v12  ;;  %v1255_v63 = vsub.f32 1.0, %v1254_v34  ;;  %v480_v58 = vld [vmem:[%s3045_s11 + $0x8] sm:$0xff]  ;;  %v1247_v12 = vand.u32 2147483647, %v3504_v57  ;;  %vm3716_vm12 = vmor %vm1258_vm7, %vm1259_vm8 }
 0x165   : > { %v3566_v6 = vpop.f32.mrf.mxu2  ;;  %v3568_v28 = vpop.f32.mrf.mxu3  ;;  %vm3607_vm2 = vcmp.eq.f32.partialorder %v1232_v4, 8.507059e+37  ;;  %v1249_v34 = vand.u32 2147483648, %v3504_v57  ;;  %2616 = vrcp.f32 %v3592_v0  ;;  %1944 = vmatpush.msra.mxu2 %v480_v58  ;;  %v2471_v57 = vmul.f32 -1.442695, %v3650_v44 }
 0x166   : > { %4892 = vst [vmem:[#allocation32_spill] sm:$0xff] %v3566_v6  ;;  %v3574_v10 = vpop.f32.mrf.mxu0  ;;  %v3576_v9 = vpop.f32.mrf.mxu1  ;;  %2008 = vmatpush.msra.mxu3 %v514_v38  ;;  %v1241_v6 = vmul.f32 %v3545_v24, %v1240_v37  ;;  %v1256_v60 = vmul.f32 %v3554_v62, %v1255_v63  ;;  %vm3652_vm6 = vcmp.eq.f32.partialorder %v1247_v12, 8.507059e+37  ;;  %v512_v63 = vld [vmem:[%s3045_s11 + $0x108] sm:$0xff]  ;;  %v2470_v12 = vmul.f32 -1.442695, %v3370_v41 }
 0x167   : > { %4893 = vst [vmem:[#allocation33_spill] sm:$0xff] %v3568_v28  ;;  %v3584_v28 = vadd.f32 %v3356_v20, %v3354_v19  ;;  %v481_v19 = vld [vmem:[%s3045_s11 + $0x10] sm:$0xff]  ;;  %v1234_v20 = vand.u32 2147483648, %v3485_v3  ;;  %vm1288_vm15 = vweird.f32 %v3558_v33  ;;  %vm1318_vm7 = vweird.f32 %v3592_v0 }
 0x168   : > { %4894 = vst [vmem:[#allocation34_spill] sm:$0xff] %v3574_v10  ;;  %1813 = vmatpush.msra.mxu0 %v481_v19  ;;  %v479_v10 = vld [vmem:[%s3045_s11] sm:$0xff]  ;;  %2009 = vmatpush.msra.mxu3 %v512_v63  ;;  %v1277_v19 = vand.u32 2147483647, %v3543_v18  ;;  %v2472_v63 = vmul.f32 -1.442695, %v3384_v47 }
 0x169   : > { %4895 = vst [vmem:[#allocation35_spill] sm:$0xff] %v3576_v9  ;;  %v3588_v9 = vpop.eup %2608  ;;  %v2469_v7 = vmul.f32 -1.442695, %v3584_v28  ;;  %896 = vmatmul.f32.gmra.mxu0 %v3296_v39  ;;  %961 = vmatmul.f32.gmra.mxu1 %v3298_v40  ;;  %v1235_v52 = vor.u32 1.1754944e-38, %v1234_v20  ;;  %v1231_v20 = vsel %vm3624_vm3, %v3521_v55, %v1227_v27  ;;  %v1250_v55 = vor.u32 1.1754944e-38, %v1249_v34 }
 0x16a   : > { %v1269_v54 = vmul.f32 %v3588_v9, %v3543_v18  ;;  %v2611_v38 = vpop.eup %2610  ;;  %1814 = vmatpush.msra.mxu0 %v479_v10  ;;  %vm1274_vm13 = vweird.f32 %v3588_v9  ;;  %vm3728_vm14 = vcmp.eq.f32.partialorder %v1277_v19, 8.507059e+37  ;;  %vm1303_vm3 = vweird.f32 %v3564_v35 }
 0x16b   : > { %v3618_v42 = vpop.eup %2612  ;;  %1026 = vmatmul.f32.gmra.mxu2 %v3296_v39  ;;  %1091 = vmatmul.f32.gmra.mxu3 %v3298_v40  ;;  %2618 = vpow2.f32 %v2469_v7  ;;  %v513_v39 = vld [vmem:[%s3045_s11 + $0x110] sm:$0xff]  ;;  %v1242_v40 = vadd.f32 %v3545_v24, %v1241_v6  ;;  %v3646_v15 = vadd.f32 1.0, %v2611_v38  ;;  %v511_v6 = vld [vmem:[%s3045_s11 + $0x100] sm:$0xff]  ;;  %v1236_v7 = vsel %vm3607_vm2, %v1235_v52, %v1231_v20  ;;  %vm3747_vm0 = vmor %vm1273_vm11, %vm1274_vm13 }
 0x16c   : > { %v3637_v3 = vpop.eup %2614  ;;  %v1270_v16 = vsub.f32 1.0, %v1269_v54  ;;  %1878 = vmatpush.msra.mxu1 %v513_v39  ;;  %v1284_v27 = vmul.f32 %v3618_v42, %v3558_v33  ;;  %v3691_v39 = vmul.f32 %v1236_v7, %v3444_v48  ;;  %vm1289_vm2 = vweird.f32 %v3618_v42 }
 0x16d   : > { %v3614_v45 = vpop.f32.mrf.mxu2  ;;  %v3616_v37 = vpop.f32.mrf.mxu3  ;;  %v1299_v54 = vmul.f32 %v3637_v3, %v3564_v35  ;;  %v1246_v34 = vsel %vm3676_vm10, %v3545_v24, %v1242_v40  ;;  %2620 = vrcp.f32 %v3646_v15  ;;  %v1292_v40 = vand.u32 2147483647, %v3558_v33 }
 0x16e   : > { %4898 = vst [vmem:[#allocation36_spill] sm:$0xff] %v3614_v45  ;;  %v1262_v45 = vand.u32 2147483647, %v3518_v36  ;;  %v3633_v10 = vpop.f32.mrf.mxu0  ;;  %v3635_v58 = vpop.f32.mrf.mxu1  ;;  %1879 = vmatpush.msra.mxu1 %v511_v6  ;;  %v3696_v6 = vadd.f32 %v3381_v2, %v3379_v1  ;;  %v1251_v1 = vsel %vm3652_vm6, %v1250_v55, %v1246_v34  ;;  %2622 = vpow2.f32 %v2470_v12  ;;  %vm3793_vm6 = vmor %vm1288_vm15, %vm1289_vm2 }
 0x16f   : > { %4899 = vst [vmem:[#allocation37_spill] sm:$0xff] %v3616_v37  ;;  %v1264_v37 = vand.u32 2147483648, %v3518_v36  ;;  %v3670_v38 = vpop.eup %2616  ;;  %v1300_v52 = vsub.f32 1.0, %v1299_v54  ;;  %v1294_v54 = vand.u32 2147483648, %v3558_v33  ;;  %2624 = vpow2.f32 %v2471_v57 }
 0x170   : > { %vm3664_vm9 = vcmp.eq.f32.partialorder %v1262_v45, 8.507059e+37  ;;  %v1257_v45 = vadd.f32 %v3554_v62, %v1256_v60  ;;  %v1285_v60 = vsub.f32 1.0, %v1284_v27  ;;  %v1314_v48 = vmul.f32 %v3670_v38, %v3592_v0 }
 0x171   : > { %v1265_v32 = vor.u32 1.1754944e-38, %v1264_v37  ;;  %v1271_v37 = vmul.f32 %v3588_v9, %v1270_v16  ;;  %v2619_v20 = vpop.eup %2618  ;;  %v1279_v16 = vand.u32 2147483648, %v3543_v18  ;;  %2626 = vpow2.f32 %v2472_v63 }
 0x172   : > { %v1261_v47 = vsel %vm3716_vm12, %v3554_v62, %v1257_v45  ;;  %v3726_v55 = vadd.f32 1.0, %v2619_v20  ;;  %v1286_v34 = vmul.f32 %v3618_v42, %v1285_v60  ;;  %v2473_v44 = vmul.f32 -1.442695, %v3696_v6 }
 0x173   : > { %v1272_v4 = vadd.f32 %v3588_v9, %v1271_v37  ;;  %v3734_v43 = vpop.eup %2620  ;;  %v1280_v12 = vor.u32 1.1754944e-38, %v1279_v16  ;;  %v1301_v62 = vmul.f32 %v3637_v3, %v1300_v52  ;;  %v1315_v45 = vsub.f32 1.0, %v1314_v48 }
 0x174   : > { %v3739_v37 = vmul.f32 %v1251_v1, %v3314_v51  ;;  %v1266_v19 = vsel %vm3664_vm9, %v1265_v32, %v1261_v47  ;;  %vm3751_vm1 = vcmp.eq.f32.partialorder %v1292_v40, 8.507059e+37  ;;  %v1295_v60 = vor.u32 1.1754944e-38, %v1294_v54  ;;  %v2623_v18 = vpop.eup %2622 }
 0x175   : > { %v3698_v41 = vpop.f32.mrf.mxu2  ;;  %v3700_v24 = vpop.f32.mrf.mxu3  ;;  %v1307_v63 = vand.u32 2147483647, %v3564_v35  ;;  %v1276_v51 = vsel %vm3747_vm0, %v3588_v9, %v1272_v4  ;;  %v1309_v47 = vand.u32 2147483648, %v3564_v35  ;;  %2628 = vrcp.f32 %v3726_v55 }
 0x176   : > { %v3706_v7 = vpop.f32.mrf.mxu0  ;;  %v3708_v27 = vpop.f32.mrf.mxu1  ;;  %v1287_v31 = vadd.f32 %v3618_v42, %v1286_v34  ;;  %v1329_v32 = vmul.f32 %v3734_v43, %v3646_v15  ;;  %2630 = vpow2.f32 %v2473_v44  ;;  %v2474_v16 = vmul.f32 -1.442695, %v3398_v53 }
 0x177   : > { %v2625_v9 = vpop.eup %2624  ;;  %v1302_v48 = vadd.f32 %v3637_v3, %v1301_v62  ;;  %vm1304_vm4 = vweird.f32 %v3637_v3  ;;  %v1316_v1 = vmul.f32 %v3670_v38, %v1315_v45  ;;  %v3775_v54 = vmul.f32 %v1266_v19, %v3470_v17 }
 0x178   : > { %v2627_v2 = vpop.eup %2626  ;;  %vm3777_vm5 = vcmp.eq.f32.partialorder %v1307_v63, 8.507059e+37  ;;  %v1322_v4 = vand.u32 2147483647, %v3592_v0  ;;  %v1324_v34 = vand.u32 2147483648, %v3592_v0  ;;  %v1281_v53 = vsel %vm3728_vm14, %v1280_v12, %v1276_v51  ;;  %vm3807_vm8 = vmor %vm1303_vm3, %vm1304_vm4 }
 0x179   : > { %v1310_v45 = vor.u32 1.1754944e-38, %v1309_v47  ;;  %v3798_v19 = vadd.f32 1.0, %v2623_v18  ;;  %v1291_v63 = vsel %vm3793_vm6, %v3618_v42, %v1287_v31  ;;  %v1330_v33 = vsub.f32 1.0, %v1329_v32 }
 0x17a   : > { %v3811_v12 = vadd.f32 1.0, %v2625_v9  ;;  %2632 = vpow2.f32 %v2474_v16  ;;  %v1306_v47 = vsel %vm3807_vm8, %v3637_v3, %v1302_v48  ;;  %v1317_v42 = vadd.f32 %v3670_v38, %v1316_v1 }
 0x17b   : > { %v3813_v51 = vpop.eup %2628  ;;  %vm1319_vm9 = vweird.f32 %v3670_v38  ;;  %v3820_v18 = vadd.f32 1.0, %v2627_v2  ;;  %v3823_v31 = vmul.f32 %v1281_v53, %v3324_v56  ;;  %vm3825_vm10 = vcmp.eq.f32.partialorder %v1322_v4, 8.507059e+37 }
 0x17c   : > { %v2631_v35 = vpop.eup %2630  ;;  %v1325_v16 = vor.u32 1.1754944e-38, %v1324_v34  ;;  %v3831_v9 = vadd.f32 %v3396_v11, %v3394_v8  ;;  %v1296_v3 = vsel %vm3751_vm1, %v1295_v60, %v1291_v63  ;;  %v1337_v48 = vand.u32 2147483647, %v3646_v15  ;;  %vm3842_vm11 = vmor %vm1318_vm7, %vm1319_vm9 }
 0x17d   : > { %v3766_v40 = vpop.f32.mrf.mxu2  ;;  %v3768_v52 = vpop.f32.mrf.mxu3  ;;  %v1339_v1 = vand.u32 2147483648, %v3646_v15  ;;  %2634 = vrcp.f32 %v3798_v19  ;;  %v1311_v56 = vsel %vm3777_vm5, %v1310_v45, %v1306_v47  ;;  %v1331_v8 = vmul.f32 %v3734_v43, %v1330_v33 }
 0x17e   : > { %v3783_v57 = vpop.f32.mrf.mxu0  ;;  %v3785_v62 = vpop.f32.mrf.mxu1  ;;  %v1344_v11 = vmul.f32 %v3813_v51, %v3726_v55  ;;  %2636 = vrcp.f32 %v3811_v12  ;;  %v1321_v20 = vsel %vm3842_vm11, %v3670_v38, %v1317_v42  ;;  %vm1333_vm12 = vweird.f32 %v3646_v15 }
 0x17f   : > { %2638 = vrcp.f32 %v3820_v18  ;;  %v3855_v0 = vadd.f32 1.0, %v2631_v35  ;;  %v3862_v4 = vmul.f32 %v1296_v3, %v3490_v23  ;;  %v2475_v34 = vmul.f32 -1.442695, %v3831_v9 }
 0x180   : > { %v2633_v44 = vpop.eup %2632  ;;  %v918_v17 = vadd.f32 %v3635_v58, %v3633_v10  ;;  %v1048_v38 = vadd.f32 %v3700_v24, %v3698_v41  ;;  %v3874_v36 = vmul.f32 %v1311_v56, %v3338_v5  ;;  %vm3876_vm13 = vcmp.eq.f32.partialorder %v1337_v48, 8.507059e+37 }
 0x181   : > { %v1340_v23 = vor.u32 1.1754944e-38, %v1339_v1  ;;  %v1354_v47 = vand.u32 2147483648, %v3726_v55  ;;  %v1326_v10 = vsel %vm3825_vm10, %v1325_v16, %v1321_v20  ;;  %v1332_v58 = vadd.f32 %v3734_v43, %v1331_v8 }
 0x182   : > { %vm1334_vm14 = vweird.f32 %v3734_v43  ;;  %v1345_v41 = vsub.f32 1.0, %v1344_v11  ;;  %2640 = vrcp.f32 %v3855_v0  ;;  %v3888_v5 = vadd.f32 1.0, %v2633_v44 }
 0x183   : > { %v3885_v24 = vpop.eup %2634  ;;  %v3892_v42 = vadd.f32 %v3406_v29, %v3404_v13  ;;  %v1735_v35 = vmul.f32 %v3691_v39, %v918_v17  ;;  %vm1348_vm15 = vweird.f32 %v3726_v55  ;;  %v1352_v32 = vand.u32 2147483647, %v3726_v55  ;;  %vm3915_vm0 = vmor %vm1333_vm12, %vm1334_vm14 }
 0x184   : > { %v3895_v3 = vpop.eup %2636  ;;  %2642 = vpow2.f32 %v2475_v34  ;;  %v1736_v16 = vmul.f32 %v3739_v37, %v1048_v38  ;;  %v3902_v1 = vor.u32 1.1754944e-38, %v1354_v47  ;;  %v1369_v56 = vand.u32 2147483648, %v3798_v19 }
 0x185   : > { %v3857_v60 = vpop.f32.mrf.mxu2  ;;  %v3859_v2 = vpop.f32.mrf.mxu3  ;;  %v2476_v13 = vmul.f32 -1.442695, %v3408_v30  ;;  %1815 = vmatmul.f32.vlgmr.msra.gmra.mxu0 %v1735_v35  ;;  %1945 = vmatmul.f32.vlgmr.msra.gmra.mxu2 %v1735_v35  ;;  %v921_v29 = vadd.f32 %v3708_v27, %v3706_v7  ;;  %v3909_v39 = vmul.f32 %v1326_v10, %v3515_v59  ;;  %v1346_v53 = vmul.f32 %v3813_v51, %v1345_v41 }
 0x186   : > { %v3869_v45 = vpop.f32.mrf.mxu0  ;;  %v3871_v63 = vpop.f32.mrf.mxu1  ;;  %v1359_v8 = vmul.f32 %v3885_v24, %v3798_v19  ;;  %1880 = vmatmul.f32.vlgmr.msra.gmra.mxu1 %v1736_v16  ;;  %v1051_v7 = vadd.f32 %v3768_v52, %v3766_v40  ;;  %v1336_v59 = vsel %vm3915_vm0, %v3734_v43, %v1332_v58  ;;  %v1374_v15 = vmul.f32 %v3895_v3, %v3811_v12 }
 0x187   : > { %v3900_v48 = vpop.eup %2638  ;;  %2644 = vrcp.f32 %v3888_v5  ;;  %v2477_v27 = vmul.f32 -1.442695, %v3892_v42  ;;  %2010 = vmatmul.f32.vlgmr.msra.gmra.mxu3 %v1736_v16  ;;  %vm1349_vm1 = vweird.f32 %v3813_v51  ;;  %vm3936_vm2 = vcmp.eq.f32.partialorder %v1352_v32, 8.507059e+37 }
 0x188   : > { %v1367_v43 = vand.u32 2147483647, %v3798_v19  ;;  %v1389_v52 = vmul.f32 %v3900_v48, %v3820_v18  ;;  %v3945_v44 = vadd.f32 %v3420_v22, %v3418_v21  ;;  %v3951_v38 = vpop.eup %2640  ;;  %v3953_v47 = vor.u32 1.1754944e-38, %v1369_v56  ;;  %vm3977_vm5 = vmor %vm1348_vm15, %vm1349_vm1 }
 0x189   : > { %v1384_v10 = vand.u32 2147483648, %v3811_v12  ;;  %2646 = vpow2.f32 %v2476_v13  ;;  %v1737_v58 = vmul.f32 %v3775_v54, %v921_v29  ;;  %v1341_v35 = vsel %vm3876_vm13, %v1340_v23, %v1336_v59 }
 0x18a   : > { %v2643_v41 = vpop.eup %2642  ;;  %v1347_v21 = vadd.f32 %v3813_v51, %v1346_v53  ;;  %v1360_v22 = vsub.f32 1.0, %v1359_v8  ;;  %v1738_v32 = vmul.f32 %v3823_v31, %v1051_v7  ;;  %v1375_v16 = vsub.f32 1.0, %v1374_v15 }
 0x18b   : > { %vm1378_vm3 = vweird.f32 %v3811_v12  ;;  %v1399_v56 = vand.u32 2147483648, %v3820_v18  ;;  %2648 = vpow2.f32 %v2477_v27  ;;  %vm1363_vm4 = vweird.f32 %v3798_v19  ;;  %v4957_v19 = vld [vmem:[#allocation14_spill] sm:$0xff] }
 0x18c   : > { %v1382_v13 = vand.u32 2147483647, %v3811_v12  ;;  %v1390_v54 = vsub.f32 1.0, %v1389_v52  ;;  %v1404_v33 = vmul.f32 %v3951_v38, %v3855_v0  ;;  %v2478_v23 = vmul.f32 -1.442695, %v3945_v44 }
 0x18d   : > { %v3931_v11 = vpop.f32.mrf.mxu2  ;;  %v3933_v20 = vpop.f32.mrf.mxu3  ;;  %v3971_v31 = vmul.f32 %v1341_v35, %v3352_v14  ;;  %v1397_v53 = vand.u32 2147483647, %v3820_v18  ;;  %v3982_v8 = vadd.f32 1.0, %v2643_v41  ;;  %1818 = vmatmul.f32.gmra.mxu0 %v1737_v58  ;;  %1948 = vmatmul.f32.gmra.mxu2 %v1737_v58  ;;  %v924_v7 = vadd.f32 %v3785_v62, %v3783_v57 }
 0x18e   : > { %v3947_v34 = vpop.f32.mrf.mxu0  ;;  %v3949_v17 = vpop.f32.mrf.mxu1  ;;  %v1351_v14 = vsel %vm3977_vm5, %v3813_v51, %v1347_v21  ;;  %v1361_v59 = vmul.f32 %v3885_v24, %v1360_v22  ;;  %v3990_v55 = vor.u32 1.1754944e-38, %v1384_v10  ;;  %vm1393_vm6 = vweird.f32 %v3820_v18  ;;  %1883 = vmatmul.f32.gmra.mxu1 %v1738_v32 }
 0x18f   : > { %v3968_v29 = vpop.eup %2644  ;;  %v1054_v15 = vadd.f32 %v3859_v2, %v3857_v60  ;;  %vm1364_vm7 = vweird.f32 %v3885_v24  ;;  %v1376_v52 = vmul.f32 %v3895_v3, %v1375_v16  ;;  %v3997_v57 = vor.u32 1.1754944e-38, %v1399_v56  ;;  %2013 = vmatmul.f32.gmra.mxu3 %v1738_v32  ;;  %v4955_v56 = vld [vmem:[#allocation13_spill] sm:$0xff] }
 0x190   : > { %v2647_v27 = vpop.eup %2646  ;;  %v4001_v62 = vadd.f32 %v3424_v26, %v3422_v25  ;;  %v1391_v58 = vmul.f32 %v3900_v48, %v1390_v54  ;;  %v1405_v41 = vsub.f32 1.0, %v1404_v33  ;;  %v1419_v60 = vmul.f32 %v3968_v29, %v3888_v5  ;;  %vm4055_vm13 = vmor %vm1363_vm4, %vm1364_vm7 }
 0x191   : > { %2650 = vpow2.f32 %v2478_v23  ;;  %v2649_v21 = vpop.eup %2648  ;;  %v1356_v25 = vsel %vm3936_vm2, %v3902_v1, %v1351_v14  ;;  %vm4017_vm8 = vcmp.eq.f32.partialorder %v1367_v43, 8.507059e+37  ;;  %vm1379_vm9 = vweird.f32 %v3895_v3 }
 0x192   : > { %2652 = vrcp.f32 %v3982_v8  ;;  %v1739_v22 = vmul.f32 %v3862_v4, %v924_v7  ;;  %v1362_v32 = vadd.f32 %v3885_v24, %v1361_v59  ;;  %vm4025_vm10 = vcmp.eq.f32.partialorder %v1382_v13, 8.507059e+37  ;;  %vm4070_vm15 = vmor %vm1378_vm3, %vm1379_vm9 }
 0x193   : > { %vm4029_vm11 = vcmp.eq.f32.partialorder %v1397_v53, 8.507059e+37  ;;  %v1412_v1 = vand.u32 2147483647, %v3855_v0  ;;  %v4034_v40 = vadd.f32 1.0, %v2647_v27  ;;  %v1740_v43 = vmul.f32 %v3874_v36, %v1054_v15 }
 0x194   : > { %v1377_v54 = vadd.f32 %v3895_v3, %v1376_v52  ;;  %vm1394_vm12 = vweird.f32 %v3900_v48  ;;  %v2479_v4 = vmul.f32 -1.442695, %v4001_v62  ;;  %v4042_v13 = vadd.f32 %v3436_v49, %v3434_v46 }
 0x195   : > { %v4003_v51 = vpop.f32.mrf.mxu2  ;;  %v4005_v10 = vpop.f32.mrf.mxu3  ;;  %v1392_v33 = vadd.f32 %v3900_v48, %v1391_v58  ;;  %v1406_v23 = vmul.f32 %v3951_v38, %v1405_v41  ;;  %v1420_v37 = vsub.f32 1.0, %v1419_v60  ;;  %v4046_v53 = vadd.f32 1.0, %v2649_v21  ;;  %1821 = vmatmul.f32.gmra.mxu0 %v1739_v22  ;;  %1951 = vmatmul.f32.gmra.mxu2 %v1739_v22  ;;  %vm4092_vm2 = vmor %vm1393_vm6, %vm1394_vm12 }
 0x196   : > { %v4010_v2 = vpop.f32.mrf.mxu0  ;;  %v4012_v35 = vpop.f32.mrf.mxu1  ;;  %v4049_v7 = vmul.f32 %v1356_v25, %v3584_v28  ;;  %vm1408_vm14 = vweird.f32 %v3855_v0  ;;  %v1414_v46 = vand.u32 2147483648, %v3855_v0  ;;  %v927_v49 = vadd.f32 %v3871_v63, %v3869_v45  ;;  %1886 = vmatmul.f32.gmra.mxu1 %v1740_v43  ;;  %v4953_v0 = vld [vmem:[#allocation16_spill] sm:$0xff] }
 0x197   : > { %v2651_v14 = vpop.eup %2650  ;;  %v1366_v28 = vsel %vm4055_vm13, %v3885_v24, %v1362_v32  ;;  %vm4074_vm0 = vcmp.eq.f32.partialorder %v1412_v1, 8.507059e+37  ;;  %vm1423_vm1 = vweird.f32 %v3888_v5  ;;  %v1427_v45 = vand.u32 2147483647, %v3888_v5  ;;  %2016 = vmatmul.f32.gmra.mxu3 %v1740_v43 }
 0x198   : > { %2654 = vrcp.f32 %v4034_v40  ;;  %v1057_v63 = vadd.f32 %v3933_v20, %v3931_v11  ;;  %v4083_v24 = vpop.eup %2652  ;;  %v1381_v12 = vsel %vm4070_vm15, %v3895_v3, %v1377_v54  ;;  %vm1409_vm3 = vweird.f32 %v3951_v38 }
 0x199   : > { %2656 = vpow2.f32 %v2479_v4  ;;  %v2480_v27 = vmul.f32 -1.442695, %v4042_v13  ;;  %v1396_v3 = vsel %vm4092_vm2, %v3900_v48, %v1392_v33  ;;  %v1407_v18 = vadd.f32 %v3951_v38, %v1406_v23  ;;  %vm4136_vm4 = vmor %vm1408_vm14, %vm1409_vm3 }
 0x19a   : > { %v1421_v52 = vmul.f32 %v3968_v29, %v1420_v37  ;;  %2658 = vrcp.f32 %v4046_v53  ;;  %v1415_v60 = vor.u32 1.1754944e-38, %v1414_v46  ;;  %v1429_v21 = vand.u32 2147483648, %v3888_v5 }
 0x19b   : > { %v4115_v25 = vadd.f32 %v3440_v61, %v3438_v50  ;;  %v1741_v22 = vmul.f32 %v3909_v39, %v927_v49  ;;  %v1371_v48 = vsel %vm4017_vm8, %v3953_v47, %v1366_v28  ;;  %v1434_v32 = vmul.f32 %v4083_v24, %v3982_v8  ;;  %v4964_v39 = vld [vmem:[#allocation20_spill] sm:$0xff] }
 0x19c   : > { %v4123_v1 = vadd.f32 1.0, %v2651_v14  ;;  %v1742_v43 = vmul.f32 %v3971_v31, %v1057_v63  ;;  %v1386_v54 = vsel %vm4025_vm10, %v3990_v55, %v1381_v12  ;;  %v1401_v50 = vsel %vm4029_vm11, %v3997_v57, %v1396_v3  ;;  %v4954_v57 = vld [vmem:[#allocation17_spill] sm:$0xff]  ;;  %v4956_v14 = vld [vmem:[#allocation38_spill] sm:$0xff] }
 0x19d   : > { %v4098_v11 = vpop.f32.mrf.mxu2  ;;  %v4100_v20 = vpop.f32.mrf.mxu3  ;;  %vm4140_vm5 = vcmp.eq.f32.partialorder %v1427_v45, 8.507059e+37  ;;  %2660 = vpow2.f32 %v2480_v27  ;;  %v1411_v31 = vsel %vm4136_vm4, %v3951_v38, %v1407_v18  ;;  %v1422_v55 = vadd.f32 %v3968_v29, %v1421_v52  ;;  %1824 = vmatmul.f32.gmra.mxu0 %v1741_v22  ;;  %1954 = vmatmul.f32.gmra.mxu2 %v1741_v22 }
 0x19e   : > { %v4108_v58 = vpop.f32.mrf.mxu0  ;;  %v4110_v41 = vpop.f32.mrf.mxu1  ;;  %vm1424_vm6 = vweird.f32 %v3968_v29  ;;  %v4153_v26 = vadd.f32 %v4954_v57, %v4953_v0  ;;  %v1712_v4 = vmul.f32 %v1371_v48, %v4955_v56  ;;  %v1430_v33 = vor.u32 1.1754944e-38, %v1429_v21  ;;  %1889 = vmatmul.f32.gmra.mxu1 %v1742_v43  ;;  %v4965_v57 = vld [vmem:[#allocation21_spill] sm:$0xff] }
 0x19f   : > { %v4144_v47 = vpop.eup %2654  ;;  %v2481_v23 = vmul.f32 -1.442695, %v4115_v25  ;;  %v930_v37 = vadd.f32 %v3949_v17, %v3947_v34  ;;  %v1435_v36 = vsub.f32 1.0, %v1434_v32  ;;  %v1444_v46 = vand.u32 2147483648, %v3982_v8  ;;  %vm4175_vm7 = vmor %vm1423_vm1, %vm1424_vm6  ;;  %2019 = vmatmul.f32.gmra.mxu3 %v1742_v43 }
 0x1a0   : > { %v2657_v16 = vpop.eup %2656  ;;  %2662 = vrcp.f32 %v4123_v1  ;;  %v1060_v49 = vadd.f32 %v4005_v10, %v4003_v51  ;;  %v1713_v28 = vmul.f32 %v1386_v54, %v4956_v14  ;;  %v4167_v45 = vmul.f32 %v1401_v50, %v4957_v19  ;;  %v4960_v50 = vld [vmem:[#allocation18_spill] sm:$0xff] }
 0x1a1   : > { %v4159_v38 = vpop.eup %2658  ;;  %v1416_v63 = vsel %vm4074_vm0, %v1415_v60, %v1411_v31  ;;  %vm1438_vm8 = vweird.f32 %v3982_v8  ;;  %v1426_v10 = vsel %vm4175_vm7, %v3968_v29, %v1422_v55  ;;  %v1442_v59 = vand.u32 2147483647, %v3982_v8 }
 0x1a2   : > { %v1449_v5 = vmul.f32 %v4144_v47, %v4034_v40  ;;  %v2482_v12 = vmul.f32 -1.442695, %v4153_v26  ;;  %v1464_v27 = vmul.f32 %v4159_v38, %v4046_v53  ;;  %v4193_v3 = vadd.f32 1.0, %v2657_v16 }
 0x1a3   : > { %v2661_v15 = vpop.eup %2660  ;;  %2664 = vpow2.f32 %v2481_v23  ;;  %v1743_v18 = vmul.f32 %v4049_v7, %v930_v37  ;;  %v4197_v52 = vmul.f32 %v1416_v63, %v3696_v6  ;;  %v1436_v29 = vmul.f32 %v4083_v24, %v1435_v36  ;;  %v4961_v7 = vld [vmem:[#allocation19_spill] sm:$0xff] }
 0x1a4   : > { %v1445_v60 = vor.u32 1.1754944e-38, %v1444_v46  ;;  %v1744_v21 = vmul.f32 %v1712_v4, %v1060_v49  ;;  %v1431_v32 = vsel %vm4140_vm5, %v1430_v33, %v1426_v10  ;;  %v1457_v43 = vand.u32 2147483647, %v4034_v40  ;;  %v4966_v23 = vld [vmem:[#allocation15_spill] sm:$0xff] }
 0x1a5   : > { %v4180_v17 = vpop.f32.mrf.mxu2  ;;  %v4182_v51 = vpop.f32.mrf.mxu3  ;;  %v1459_v54 = vand.u32 2147483648, %v4034_v40  ;;  %v4210_v61 = vadd.f32 %v4961_v7, %v4960_v50  ;;  %vm4214_vm9 = vcmp.eq.f32.partialorder %v1442_v59, 8.507059e+37  ;;  %v1450_v55 = vsub.f32 1.0, %v1449_v5  ;;  %1827 = vmatmul.f32.gmra.mxu0 %v1743_v18  ;;  %1957 = vmatmul.f32.gmra.mxu2 %v1743_v18  ;;  %v4986_v18 = vld [vmem:[#allocation29_spill] sm:$0xff] }
 0x1a6   : > { %v4200_v22 = vpop.f32.mrf.mxu0  ;;  %v4202_v48 = vpop.f32.mrf.mxu1  ;;  %v4218_v0 = vadd.f32 1.0, %v2661_v15  ;;  %2666 = vpow2.f32 %v2482_v12  ;;  %v4222_v16 = vadd.f32 %v4965_v57, %v4964_v39  ;;  %v1465_v56 = vsub.f32 1.0, %v1464_v27  ;;  %1892 = vmatmul.f32.gmra.mxu1 %v1744_v21  ;;  %v4975_v39 = vld [vmem:[#allocation24_spill] sm:$0xff]  ;;  %v4976_v57 = vld [vmem:[#allocation25_spill] sm:$0xff] }
 0x1a7   : > { %v4212_v6 = vpop.eup %2662  ;;  %v1474_v4 = vand.u32 2147483648, %v4046_v53  ;;  %2668 = vrcp.f32 %v4193_v3  ;;  %v933_v33 = vadd.f32 %v4012_v35, %v4010_v2  ;;  %v4229_v37 = vmul.f32 %v1431_v32, %v4966_v23  ;;  %2022 = vmatmul.f32.gmra.mxu3 %v1744_v21  ;;  %v4972_v21 = vld [vmem:[#allocation23_spill] sm:$0xff] }
 0x1a8   : > { %v1437_v36 = vadd.f32 %v4083_v24, %v1436_v29  ;;  %vm1439_vm10 = vweird.f32 %v4083_v24  ;;  %vm1453_vm11 = vweird.f32 %v4034_v40  ;;  %v1063_v46 = vadd.f32 %v4100_v20, %v4098_v11  ;;  %v4971_v29 = vld [vmem:[#allocation22_spill] sm:$0xff] }
 0x1a9   : > { %v2665_v49 = vpop.eup %2664  ;;  %v4236_v14 = vor.u32 1.1754944e-38, %v1459_v54  ;;  %vm1468_vm12 = vweird.f32 %v4046_v53  ;;  %v1479_v2 = vmul.f32 %v4212_v6, %v4123_v1  ;;  %v2483_v35 = vmul.f32 -1.442695, %v4210_v61  ;;  %vm4254_vm13 = vmor %vm1438_vm8, %vm1439_vm10 }
 0x1aa   : > { %v1451_v34 = vmul.f32 %v4144_v47, %v1450_v55  ;;  %v1472_v10 = vand.u32 2147483647, %v4046_v53  ;;  %2670 = vrcp.f32 %v4218_v0  ;;  %v2484_v11 = vmul.f32 -1.442695, %v4222_v16 }
 0x1ab   : > { %vm1454_vm14 = vweird.f32 %v4144_v47  ;;  %v1466_v59 = vmul.f32 %v4159_v38, %v1465_v56  ;;  %v4260_v5 = vor.u32 1.1754944e-38, %v1474_v4  ;;  %v1745_v12 = vmul.f32 %v1713_v28, %v933_v33 }
 0x1ac   : > { %v2667_v15 = vpop.eup %2666  ;;  %v1441_v27 = vsel %vm4254_vm13, %v4083_v24, %v1437_v36  ;;  %vm4265_vm15 = vcmp.eq.f32.partialorder %v1457_v43, 8.507059e+37  ;;  %v4269_v8 = vadd.f32 1.0, %v2665_v49  ;;  %v4273_v32 = vadd.f32 %v4972_v21, %v4971_v29  ;;  %vm4313_vm2 = vmor %vm1453_vm11, %vm1454_vm14 }
 0x1ad   : > { %v4242_v19 = vpop.f32.mrf.mxu2  ;;  %v4244_v63 = vpop.f32.mrf.mxu3  ;;  %v1746_v54 = vmul.f32 %v4167_v45, %v1063_v46  ;;  %v1480_v28 = vsub.f32 1.0, %v1479_v2  ;;  %v1487_v7 = vand.u32 2147483647, %v4123_v1  ;;  %v1489_v55 = vand.u32 2147483648, %v4123_v1  ;;  %1830 = vmatmul.f32.gmra.mxu0 %v1745_v12  ;;  %1960 = vmatmul.f32.gmra.mxu2 %v1745_v12 }
 0x1ae   : > { %v4276_v50 = vpop.eup %2668  ;;  %2672 = vpow2.f32 %v2483_v35  ;;  %v1452_v24 = vadd.f32 %v4144_v47, %v1451_v34  ;;  %vm1469_vm0 = vweird.f32 %v4159_v38  ;;  %vm4282_vm1 = vcmp.eq.f32.partialorder %v1472_v10, 8.507059e+37  ;;  %v4290_v56 = vpop.f32.mrf.mxu0 }
 0x1af   : > { %2674 = vpow2.f32 %v2484_v11  ;;  %v4288_v45 = vadd.f32 %v4976_v57, %v4975_v39  ;;  %v4292_v4 = vpop.f32.mrf.mxu1  ;;  %v1446_v33 = vsel %vm4214_vm9, %v1445_v60, %v1441_v27  ;;  %v1467_v23 = vadd.f32 %v4159_v38, %v1466_v59  ;;  %1895 = vmatmul.f32.gmra.mxu1 %v1746_v54  ;;  %2025 = vmatmul.f32.gmra.mxu3 %v1746_v54  ;;  %vm4336_vm4 = vmor %vm1468_vm12, %vm1469_vm0 }
 0x1b0   : > { %v4297_v36 = vadd.f32 1.0, %v2667_v15  ;;  %v936_v46 = vadd.f32 %v4110_v41, %v4108_v58  ;;  %v4301_v49 = vpop.eup %2670  ;;  %v1494_v2 = vmul.f32 %v4276_v50, %v4193_v3  ;;  %2676 = vrcp.f32 %v4269_v8 }
 0x1b1   : > { %v2485_v35 = vmul.f32 -1.442695, %v4273_v32  ;;  %v1066_v60 = vadd.f32 %v4182_v51, %v4180_v17  ;;  %v1481_v58 = vmul.f32 %v4212_v6, %v1480_v28  ;;  %vm1483_vm3 = vweird.f32 %v4123_v1 }
 0x1b2   : > { %v4319_v41 = vor.u32 1.1754944e-38, %v1489_v55  ;;  %v1504_v34 = vand.u32 2147483648, %v4193_v3  ;;  %v1717_v51 = vmul.f32 %v1446_v33, %v3831_v9  ;;  %v1456_v40 = vsel %vm4313_vm2, %v4144_v47, %v1452_v24  ;;  %v4984_v55 = vld [vmem:[#allocation27_spill] sm:$0xff]  ;;  %v4995_v9 = vld [vmem:[#allocation32_spill] sm:$0xff] }
 0x1b3   : > { %v1502_v11 = vand.u32 2147483647, %v4193_v3  ;;  %v2486_v20 = vmul.f32 -1.442695, %v4288_v45  ;;  %vm1484_vm5 = vweird.f32 %v4212_v6  ;;  %vm4341_vm6 = vcmp.eq.f32.partialorder %v1487_v7, 8.507059e+37 }
 0x1b4   : > { %v2673_v59 = vpop.eup %2672  ;;  %v1509_v47 = vmul.f32 %v4301_v49, %v4218_v0  ;;  %2678 = vrcp.f32 %v4297_v36  ;;  %v1747_v15 = vmul.f32 %v4197_v52, %v936_v46  ;;  %v1471_v53 = vsel %vm4336_vm4, %v4159_v38, %v1467_v23  ;;  %v4983_v52 = vld [vmem:[#allocation26_spill] sm:$0xff]  ;;  %vm4385_vm8 = vmor %vm1483_vm3, %vm1484_vm5 }
 0x1b5   : > { %v4322_v10 = vpop.f32.mrf.mxu2  ;;  %v4324_v17 = vpop.f32.mrf.mxu3  ;;  %v1495_v29 = vsub.f32 1.0, %v1494_v2  ;;  %2680 = vpow2.f32 %v2485_v35  ;;  %v1748_v21 = vmul.f32 %v4229_v37, %v1066_v60  ;;  %v1461_v54 = vsel %vm4265_vm15, %v4236_v14, %v1456_v40  ;;  %v4985_v37 = vld [vmem:[#allocation28_spill] sm:$0xff] }
 0x1b6   : > { %v2675_v27 = vpop.eup %2674  ;;  %v1482_v28 = vadd.f32 %v4212_v6, %v1481_v58  ;;  %vm1498_vm7 = vweird.f32 %v4193_v3  ;;  %v4358_v7 = vor.u32 1.1754944e-38, %v1504_v34  ;;  %v4362_v24 = vadd.f32 %v4984_v55, %v4983_v52  ;;  %1833 = vmatmul.f32.gmra.mxu0 %v1747_v15  ;;  %1963 = vmatmul.f32.gmra.mxu2 %v1747_v15  ;;  %v4393_v58 = vpop.f32.mrf.mxu0  ;;  %v4993_v52 = vld [vmem:[#allocation30_spill] sm:$0xff]  ;;  %v4994_v55 = vld [vmem:[#allocation31_spill] sm:$0xff] }
 0x1b7   : > { %v4364_v39 = vpop.eup %2676  ;;  %v1519_v38 = vand.u32 2147483648, %v4218_v0  ;;  %v4367_v57 = vadd.f32 1.0, %v2673_v59  ;;  %2682 = vpow2.f32 %v2486_v20  ;;  %v4371_v14 = vadd.f32 %v4986_v18, %v4985_v37  ;;  %1898 = vmatmul.f32.gmra.mxu1 %v1748_v21  ;;  %2028 = vmatmul.f32.gmra.mxu3 %v1748_v21  ;;  %v4996_v37 = vld [vmem:[#allocation33_spill] sm:$0xff] }
 0x1b8   : > { %v1476_v33 = vsel %vm4282_vm1, %v4260_v5, %v1471_v53  ;;  %v1510_v23 = vsub.f32 1.0, %v1509_v47  ;;  %v4376_v46 = vadd.f32 1.0, %v2675_v27  ;;  %v939_v2 = vadd.f32 %v4202_v48, %v4200_v22  ;;  %v4395_v22 = vpop.f32.mrf.mxu1 }
 0x1b9   : > { %v1718_v35 = vmul.f32 %v1461_v54, %v3408_v30  ;;  %v1496_v5 = vmul.f32 %v4276_v50, %v1495_v29  ;;  %v1517_v43 = vand.u32 2147483647, %v4218_v0  ;;  %v1069_v31 = vadd.f32 %v4244_v63, %v4242_v19 }
 0x1ba   : > { %v4397_v30 = vpop.eup %2678  ;;  %v1486_v1 = vsel %vm4385_vm8, %v4212_v6, %v1482_v28  ;;  %vm1499_vm9 = vweird.f32 %v4276_v50  ;;  %vm1513_vm10 = vweird.f32 %v4218_v0  ;;  %v1524_v48 = vmul.f32 %v4364_v39, %v4269_v8 }
 0x1bb   : > { %v2487_v34 = vmul.f32 -1.442695, %v4362_v24  ;;  %v2681_v19 = vpop.eup %2680  ;;  %v1719_v63 = vmul.f32 %v1476_v33, %v3892_v42  ;;  %v4408_v40 = vor.u32 1.1754944e-38, %v1519_v38  ;;  %2684 = vrcp.f32 %v4367_v57  ;;  %vm4460_vm15 = vmor %vm1498_vm7, %vm1499_vm9 }
 0x1bc   : > { %v2488_v20 = vmul.f32 -1.442695, %v4371_v14  ;;  %vm4412_vm11 = vcmp.eq.f32.partialorder %v1502_v11, 8.507059e+37  ;;  %v1511_v59 = vmul.f32 %v4301_v49, %v1510_v23  ;;  %v1534_v12 = vand.u32 2147483648, %v4269_v8 }
 0x1bd   : > { %2686 = vrcp.f32 %v4376_v46  ;;  %v1749_v47 = vmul.f32 %v1717_v51, %v939_v2  ;;  %v4419_v15 = vpop.f32.mrf.mxu2  ;;  %v4421_v42 = vpop.f32.mrf.mxu3  ;;  %v1491_v53 = vsel %vm4341_vm6, %v4319_v41, %v1486_v1  ;;  %v1497_v11 = vadd.f32 %v4276_v50, %v1496_v5 }
 0x1be   : > { %v2683_v27 = vpop.eup %2682  ;;  %v1539_v29 = vmul.f32 %v4397_v30, %v4297_v36  ;;  %v1750_v21 = vmul.f32 %v1718_v35, %v1069_v31  ;;  %vm4429_vm12 = vcmp.eq.f32.partialorder %v1517_v43, 8.507059e+37  ;;  %v1525_v51 = vsub.f32 1.0, %v1524_v48 }
 0x1bf   : > { %v4433_v28 = vadd.f32 1.0, %v2681_v19  ;;  %2688 = vpow2.f32 %v2487_v34  ;;  %v4437_v38 = vadd.f32 %v4994_v55, %v4993_v52  ;;  %vm1514_vm13 = vweird.f32 %v4301_v49  ;;  %1836 = vmatmul.f32.gmra.mxu0 %v1749_v47  ;;  %1966 = vmatmul.f32.gmra.mxu2 %v1749_v47  ;;  %v5003_v55 = vld [vmem:[#allocation34_spill] sm:$0xff] }
 0x1c0   : > { %vm1528_vm14 = vweird.f32 %v4269_v8  ;;  %v1532_v41 = vand.u32 2147483647, %v4269_v8  ;;  %2690 = vpow2.f32 %v2488_v20  ;;  %v4444_v18 = vadd.f32 %v4996_v37, %v4995_v9  ;;  %1901 = vmatmul.f32.gmra.mxu1 %v1750_v21  ;;  %2031 = vmatmul.f32.gmra.mxu3 %v1750_v21  ;;  %vm4479_vm0 = vmor %vm1513_vm10, %vm1514_vm13  ;;  %v4489_v19 = vpop.f32.mrf.mxu1  ;;  %v5004_v9 = vld [vmem:[#allocation35_spill] sm:$0xff] }
 0x1c1   : > { %v1512_v33 = vadd.f32 %v4301_v49, %v1511_v59  ;;  %v4447_v23 = vor.u32 1.1754944e-38, %v1534_v12  ;;  %v4449_v2 = vadd.f32 1.0, %v2683_v27  ;;  %v942_v35 = vadd.f32 %v4292_v4, %v4290_v56  ;;  %v4453_v60 = vpop.eup %2684 }
 0x1c2   : > { %v1720_v5 = vmul.f32 %v1491_v53, %v3945_v44  ;;  %v1540_v31 = vsub.f32 1.0, %v1539_v29  ;;  %v1549_v1 = vand.u32 2147483648, %v4297_v36  ;;  %v1072_v48 = vadd.f32 %v4324_v17, %v4322_v10  ;;  %v4487_v17 = vpop.f32.mrf.mxu0 }
 0x1c3   : > { %v4467_v56 = vpop.eup %2686  ;;  %v1501_v44 = vsel %vm4460_vm15, %v4276_v50, %v1497_v11  ;;  %v1526_v4 = vmul.f32 %v4364_v39, %v1525_v51  ;;  %2692 = vrcp.f32 %v4433_v28  ;;  %v2489_v3 = vmul.f32 -1.442695, %v4437_v38 }
 0x1c4   : > { %vm1529_vm1 = vweird.f32 %v4364_v39  ;;  %vm1543_vm2 = vweird.f32 %v4297_v36  ;;  %v1547_v50 = vand.u32 2147483647, %v4297_v36  ;;  %v2490_v10 = vmul.f32 -1.442695, %v4444_v18 }
 0x1c5   : > { %v2689_v20 = vpop.eup %2688  ;;  %v1516_v0 = vsel %vm4479_vm0, %v4301_v49, %v1512_v33  ;;  %v1554_v59 = vmul.f32 %v4453_v60, %v4367_v57  ;;  %2694 = vrcp.f32 %v4449_v2  ;;  %v1751_v12 = vmul.f32 %v1719_v63, %v942_v35  ;;  %v4497_v47 = vpop.f32.mrf.mxu2  ;;  %v5007_v33 = vld [vmem:[#allocation36_spill] sm:$0xff]  ;;  %v5008_v35 = vld [vmem:[#allocation37_spill] sm:$0xff]  ;;  %vm4547_vm6 = vmor %vm1528_vm14, %vm1529_vm1 }
 0x1c6   : > { %v4499_v27 = vpop.f32.mrf.mxu3  ;;  %v2691_v53 = vpop.eup %2690  ;;  %v1506_v11 = vsel %vm4412_vm11, %v4358_v7, %v1501_v44  ;;  %vm4504_vm3 = vcmp.eq.f32.partialorder %v1532_v41, 8.507059e+37  ;;  %v1541_v49 = vmul.f32 %v4397_v30, %v1540_v31  ;;  %v1569_v21 = vmul.f32 %v4467_v56, %v4376_v46 }
 0x1c7   : > { %v1752_v51 = vmul.f32 %v1720_v5, %v1072_v48  ;;  %v1527_v63 = vadd.f32 %v4364_v39, %v1526_v4  ;;  %v1550_v52 = vor.u32 1.1754944e-38, %v1549_v1  ;;  %2696 = vpow2.f32 %v2489_v3  ;;  %1839 = vmatmul.f32.gmra.mxu0 %v1751_v12  ;;  %1969 = vmatmul.f32.gmra.mxu2 %v1751_v12 }
 0x1c8   : > { %v4514_v37 = vadd.f32 %v5004_v9, %v5003_v55  ;;  %v1521_v7 = vsel %vm4429_vm12, %v4408_v40, %v1516_v0  ;;  %vm4519_vm4 = vcmp.eq.f32.partialorder %v1547_v50, 8.507059e+37  ;;  %v4523_v41 = vadd.f32 1.0, %v2689_v20 }
 0x1c9   : > { %2698 = vpow2.f32 %v2490_v10  ;;  %v4527_v5 = vadd.f32 %v5008_v35, %v5007_v33  ;;  %v4529_v43 = vpop.eup %2692  ;;  %v1721_v31 = vmul.f32 %v1506_v11, %v4001_v62  ;;  %v1555_v1 = vsub.f32 1.0, %v1554_v59  ;;  %1904 = vmatmul.f32.gmra.mxu1 %v1752_v51  ;;  %2034 = vmatmul.f32.gmra.mxu3 %v1752_v51 }
 0x1ca   : > { %v4532_v48 = vadd.f32 1.0, %v2691_v53  ;;  %v945_v40 = vadd.f32 %v4395_v22, %v4393_v58  ;;  %v1542_v54 = vadd.f32 %v4397_v30, %v1541_v49  ;;  %vm1544_vm5 = vweird.f32 %v4397_v30  ;;  %v885_v11 = vpop.f32.mrf.mxu0  ;;  %v950_v49 = vpop.f32.mrf.mxu1 }
 0x1cb   : > { %v1570_v44 = vsub.f32 1.0, %v1569_v21  ;;  %v1075_v4 = vadd.f32 %v4421_v42, %v4419_v15  ;;  %v4540_v3 = vpop.eup %2694  ;;  %v1722_v62 = vmul.f32 %v1521_v7, %v4042_v13  ;;  %vm1558_vm7 = vweird.f32 %v4367_v57  ;;  %vm4565_vm8 = vmor %vm1543_vm2, %vm1544_vm5 }
 0x1cc   : > { %v1562_v58 = vand.u32 2147483647, %v4367_v57  ;;  %v2491_v22 = vmul.f32 -1.442695, %v4514_v37  ;;  %v1531_v15 = vsel %vm4547_vm6, %v4364_v39, %v1527_v63  ;;  %v1584_v13 = vmul.f32 %v4529_v43, %v4433_v28 }
 0x1cd   : > { %2700 = vrcp.f32 %v4523_v41  ;;  %v2492_v8 = vmul.f32 -1.442695, %v4527_v5  ;;  %v2697_v42 = vpop.eup %2696  ;;  %v1556_v10 = vmul.f32 %v4453_v60, %v1555_v1  ;;  %v1564_v39 = vand.u32 2147483648, %v4367_v57 }
 0x1ce   : > { %2702 = vrcp.f32 %v4532_v48  ;;  %v1753_v20 = vmul.f32 %v1721_v31, %v945_v40  ;;  %v1546_v59 = vsel %vm4565_vm8, %v4397_v30, %v1542_v54  ;;  %v1571_v12 = vmul.f32 %v4467_v56, %v1570_v44  ;;  %v4586_v30 = vpop.f32.mrf.mxu2  ;;  %v1080_v63 = vpop.f32.mrf.mxu3 }
 0x1cf   : > { %v2699_v0 = vpop.eup %2698  ;;  %v1599_v36 = vmul.f32 %v4540_v3, %v4449_v2  ;;  %v1754_v53 = vmul.f32 %v1722_v62, %v1075_v4  ;;  %v1536_v21 = vsel %vm4504_vm3, %v4447_v23, %v1531_v15  ;;  %vm1559_vm9 = vweird.f32 %v4453_v60 }
 0x1d0   : > { %vm4582_vm10 = vcmp.eq.f32.partialorder %v1562_v58, 8.507059e+37  ;;  %2704 = vpow2.f32 %v2491_v22  ;;  %v1577_v55 = vand.u32 2147483647, %v4376_v46  ;;  %v1585_v9 = vsub.f32 1.0, %v1584_v13  ;;  %1842 = vmatmul.f32.gmra.mxu0 %v1753_v20  ;;  %1972 = vmatmul.f32.gmra.mxu2 %v1753_v20  ;;  %vm4614_vm13 = vmor %vm1558_vm7, %vm1559_vm9 }
 0x1d1   : > { %v4589_v7 = vadd.f32 1.0, %v2697_v42  ;;  %2706 = vpow2.f32 %v2492_v8  ;;  %v1551_v29 = vsel %vm4519_vm4, %v1550_v52, %v1546_v59  ;;  %v1557_v23 = vadd.f32 %v4453_v60, %v1556_v10  ;;  %1907 = vmatmul.f32.gmra.mxu1 %v1754_v53  ;;  %2037 = vmatmul.f32.gmra.mxu3 %v1754_v53 }
 0x1d2   : > { %v4594_v33 = vadd.f32 1.0, %v2699_v0  ;;  %v948_v35 = vadd.f32 %v4489_v19, %v4487_v17  ;;  %v1572_v1 = vadd.f32 %v4467_v56, %v1571_v12  ;;  %vm1574_vm11 = vweird.f32 %v4467_v56  ;;  %v953_v20 = vpop.f32.mrf.mxu1 }
 0x1d3   : > { %v4598_v31 = vpop.eup %2700  ;;  %v1600_v40 = vsub.f32 1.0, %v1599_v36  ;;  %v1078_v52 = vadd.f32 %v4499_v27, %v4497_v47  ;;  %v1723_v54 = vmul.f32 %v1536_v21, %v4115_v25  ;;  %v1565_v44 = vor.u32 1.1754944e-38, %v1564_v39  ;;  %v888_v39 = vpop.f32.mrf.mxu0 }
 0x1d4   : > { %v4604_v6 = vpop.eup %2702  ;;  %vm1573_vm12 = vweird.f32 %v4376_v46  ;;  %v1579_v17 = vand.u32 2147483648, %v4376_v46  ;;  %v1724_v19 = vmul.f32 %v1551_v29, %v4153_v26  ;;  %vm4618_vm14 = vcmp.eq.f32.partialorder %v1577_v55, 8.507059e+37 }
 0x1d5   : > { %v1586_v25 = vmul.f32 %v4529_v43, %v1585_v9  ;;  %2708 = vrcp.f32 %v4589_v7  ;;  %v1561_v26 = vsel %vm4614_vm13, %v4453_v60, %v1557_v23  ;;  %vm4629_vm15 = vmor %vm1573_vm12, %vm1574_vm11  ;;  %v1614_v27 = vmul.f32 %v4598_v31, %v4523_v41 }
 0x1d6   : > { %v2705_v46 = vpop.eup %2704  ;;  %2710 = vrcp.f32 %v4594_v33  ;;  %v1755_v62 = vmul.f32 %v1723_v54, %v948_v35  ;;  %v1576_v58 = vsel %vm4629_vm15, %v4467_v56, %v1572_v1  ;;  %v1601_v22 = vmul.f32 %v4540_v3, %v1600_v40  ;;  %v1018_v53 = vpop.f32.mrf.mxu2 }
 0x1d7   : > { %v2707_v34 = vpop.eup %2706  ;;  %v1629_v60 = vmul.f32 %v4604_v6, %v4532_v48  ;;  %v1756_v15 = vmul.f32 %v1724_v19, %v1078_v52  ;;  %v1580_v13 = vor.u32 1.1754944e-38, %v1579_v17  ;;  %vm1588_vm0 = vweird.f32 %v4433_v28  ;;  %v1083_v21 = vpop.f32.mrf.mxu3 }
 0x1d8   : > { %v1592_v8 = vand.u32 2147483647, %v4433_v28  ;;  %v1594_v42 = vand.u32 2147483648, %v4433_v28  ;;  %v1566_v50 = vsel %vm4582_vm10, %v1565_v44, %v1561_v26  ;;  %v1587_v10 = vadd.f32 %v4529_v43, %v1586_v25  ;;  %1845 = vmatmul.f32.gmra.mxu0 %v1755_v62  ;;  %1975 = vmatmul.f32.gmra.mxu2 %v1755_v62 }
 0x1d9   : > { %vm1589_vm1 = vweird.f32 %v4529_v43  ;;  %v4649_v56 = vadd.f32 1.0, %v2705_v46  ;;  %v1581_v0 = vsel %vm4618_vm14, %v1580_v13, %v1576_v58  ;;  %v1615_v59 = vsub.f32 1.0, %v1614_v27  ;;  %1910 = vmatmul.f32.gmra.mxu1 %v1756_v15  ;;  %2040 = vmatmul.f32.gmra.mxu3 %v1756_v15 }
 0x1da   : > { %v4653_v12 = vadd.f32 1.0, %v2707_v34  ;;  %v951_v36 = vadd.f32 %v950_v49, %v885_v11  ;;  %v1602_v55 = vadd.f32 %v4540_v3, %v1601_v22  ;;  %vm1604_vm2 = vweird.f32 %v4540_v3  ;;  %vm4667_vm3 = vmor %vm1588_vm0, %vm1589_vm1  ;;  %v956_v58 = vpop.f32.mrf.mxu1 }
 0x1db   : > { %v4655_v51 = vpop.eup %2708  ;;  %v1630_v9 = vsub.f32 1.0, %v1629_v60  ;;  %v1081_v29 = vadd.f32 %v1080_v63, %v4586_v30  ;;  %v1725_v35 = vmul.f32 %v1566_v50, %v4210_v61  ;;  %v1595_v49 = vor.u32 1.1754944e-38, %v1594_v42  ;;  %v891_v34 = vpop.f32.mrf.mxu0 }
 0x1dc   : > { %v4660_v23 = vpop.eup %2710  ;;  %vm1603_vm4 = vweird.f32 %v4449_v2  ;;  %v1609_v1 = vand.u32 2147483648, %v4449_v2  ;;  %v1726_v30 = vmul.f32 %v1581_v0, %v4222_v16  ;;  %v1591_v61 = vsel %vm4667_vm3, %v4529_v43, %v1587_v10 }
 0x1dd   : > { %v1607_v63 = vand.u32 2147483647, %v4449_v2  ;;  %2712 = vrcp.f32 %v4649_v56  ;;  %vm4681_vm5 = vmor %vm1603_vm4, %vm1604_vm2  ;;  %v1616_v40 = vmul.f32 %v4598_v31, %v1615_v59  ;;  %v1644_v52 = vmul.f32 %v4655_v51, %v4589_v7 }
 0x1de   : > { %2714 = vrcp.f32 %v4653_v12  ;;  %v1757_v16 = vmul.f32 %v1725_v35, %v951_v36  ;;  %v1606_v2 = vsel %vm4681_vm5, %v4540_v3, %v1602_v55  ;;  %v1631_v43 = vmul.f32 %v4604_v6, %v1630_v9  ;;  %v1021_v42 = vpop.f32.mrf.mxu2 }
 0x1df   : > { %v1659_v54 = vmul.f32 %v4660_v23, %v4594_v33  ;;  %v1758_v44 = vmul.f32 %v1726_v30, %v1081_v29  ;;  %vm1593_vm6 = vcmp.eq.f32.partialorder %v1592_v8, 8.507059e+37  ;;  %v1610_v17 = vor.u32 1.1754944e-38, %v1609_v1  ;;  %v1086_v50 = vpop.f32.mrf.mxu3 }
 0x1e0   : > { %vm1618_vm7 = vweird.f32 %v4523_v41  ;;  %v1596_v19 = vsel %vm1593_vm6, %v1595_v49, %v1591_v61  ;;  %vm1608_vm8 = vcmp.eq.f32.partialorder %v1607_v63, 8.507059e+37  ;;  %vm1619_vm9 = vweird.f32 %v4598_v31  ;;  %1848 = vmatmul.f32.gmra.mxu0 %v1757_v16  ;;  %1978 = vmatmul.f32.gmra.mxu2 %v1757_v16 }
 0x1e1   : > { %v1624_v4 = vand.u32 2147483648, %v4523_v41  ;;  %v1611_v47 = vsel %vm1608_vm8, %v1610_v17, %v1606_v2  ;;  %v1617_v25 = vadd.f32 %v4598_v31, %v1616_v40  ;;  %v1645_v3 = vsub.f32 1.0, %v1644_v52  ;;  %1913 = vmatmul.f32.gmra.mxu1 %v1758_v44  ;;  %2043 = vmatmul.f32.gmra.mxu3 %v1758_v44  ;;  %vm4714_vm11 = vmor %vm1618_vm7, %vm1619_vm9 }
 0x1e2   : > { %v954_v46 = vadd.f32 %v953_v20, %v888_v39  ;;  %v1632_v57 = vadd.f32 %v4604_v6, %v1631_v43  ;;  %vm1634_vm10 = vweird.f32 %v4604_v6  ;;  %v1660_v27 = vsub.f32 1.0, %v1659_v54  ;;  %v959_v2 = vpop.f32.mrf.mxu1 }
 0x1e3   : > { %v4699_v26 = vpop.eup %2712  ;;  %v1084_v62 = vadd.f32 %v1083_v21, %v1018_v53  ;;  %v1727_v60 = vmul.f32 %v1596_v19, %v4273_v32  ;;  %v1622_v15 = vand.u32 2147483647, %v4523_v41  ;;  %v1637_v13 = vand.u32 2147483647, %v4532_v48 }
 0x1e4   : > { %v4703_v22 = vpop.eup %2714  ;;  %v1639_v8 = vand.u32 2147483648, %v4532_v48  ;;  %v1728_v10 = vmul.f32 %v1611_v47, %v4288_v45  ;;  %v1625_v32 = vor.u32 1.1754944e-38, %v1624_v4  ;;  %vm1633_vm12 = vweird.f32 %v4532_v48 }
 0x1e5   : > { %v1621_v20 = vsel %vm4714_vm11, %v4598_v31, %v1617_v25  ;;  %vm4724_vm13 = vmor %vm1633_vm12, %vm1634_vm10  ;;  %v1646_v45 = vmul.f32 %v4655_v51, %v1645_v3  ;;  %v1674_v41 = vmul.f32 %v4699_v26, %v4649_v56  ;;  %v1759_v59 = vmul.f32 %v1727_v60, %v954_v46 }
 0x1e6   : > { %v1636_v48 = vsel %vm4724_vm13, %v4604_v6, %v1632_v57  ;;  %v1661_v36 = vmul.f32 %v4660_v23, %v1660_v27  ;;  %v1689_v31 = vmul.f32 %v4703_v22, %v4653_v12  ;;  %v1760_v53 = vmul.f32 %v1728_v10, %v1084_v62  ;;  %v1024_v54 = vpop.f32.mrf.mxu2 }
 0x1e7   : > { %vm1623_vm14 = vcmp.eq.f32.partialorder %v1622_v15, 8.507059e+37  ;;  %vm1638_vm15 = vcmp.eq.f32.partialorder %v1637_v13, 8.507059e+37  ;;  %v1640_v21 = vor.u32 1.1754944e-38, %v1639_v8  ;;  %vm1648_vm0 = vweird.f32 %v4589_v7  ;;  %v1089_v44 = vpop.f32.mrf.mxu3 }
 0x1e8   : > { %v1626_v55 = vsel %vm1623_vm14, %v1625_v32, %v1621_v20  ;;  %vm1649_vm1 = vweird.f32 %v4655_v51  ;;  %v1654_v9 = vand.u32 2147483648, %v4589_v7  ;;  %v1647_v35 = vadd.f32 %v4655_v51, %v1646_v45  ;;  %1851 = vmatmul.f32.gmra.mxu0 %v1759_v59  ;;  %1981 = vmatmul.f32.gmra.mxu2 %v1759_v59 }
 0x1e9   : > { %v1641_v29 = vsel %vm1638_vm15, %v1640_v21, %v1636_v48  ;;  %v1675_v6 = vsub.f32 1.0, %v1674_v41  ;;  %v957_v11 = vadd.f32 %v956_v58, %v891_v34  ;;  %v1662_v49 = vadd.f32 %v4660_v23, %v1661_v36  ;;  %1916 = vmatmul.f32.gmra.mxu1 %v1760_v53  ;;  %2046 = vmatmul.f32.gmra.mxu3 %v1760_v53  ;;  %vm4751_vm3 = vmor %vm1648_vm0, %vm1649_vm1 }
 0x1ea   : > { %vm1664_vm2 = vweird.f32 %v4660_v23  ;;  %v1690_v1 = vsub.f32 1.0, %v1689_v31  ;;  %v1087_v30 = vadd.f32 %v1086_v50, %v1021_v42  ;;  %v1729_v61 = vmul.f32 %v1626_v55, %v4362_v24  ;;  %v894_v24 = vpop.f32.mrf.mxu0  ;;  %v1767_v31 = vld [vmem:[#allocation2 + $0xb0] sm:$0xff] }
 0x1eb   : > { %v1652_v63 = vand.u32 2147483647, %v4589_v7  ;;  %v1669_v28 = vand.u32 2147483648, %v4594_v33  ;;  %v1730_v40 = vmul.f32 %v1641_v29, %v4371_v14  ;;  %vm1663_vm4 = vweird.f32 %v4594_v33 }
 0x1ec   : > { %v1667_v16 = vand.u32 2147483647, %v4594_v33  ;;  %v1651_v43 = vsel %vm4751_vm3, %v4655_v51, %v1647_v35  ;;  %vm1665_vm5 = vmor %vm1663_vm4, %vm1664_vm2  ;;  %v1676_v14 = vmul.f32 %v4699_v26, %v1675_v6  ;;  %v1761_v7 = vmul.f32 %v1729_v61, %v957_v11  ;;  %v1768_v35 = vld [vmem:[#allocation2] sm:$0xff]  ;;  %v1769_v11 = vld [vmem:[#allocation2 + $0xd8] sm:$0xff] }
 0x1ed   : > { %v1655_v17 = vor.u32 1.1754944e-38, %v1654_v9  ;;  %v1666_v19 = vsel %vm1665_vm5, %v4660_v23, %v1662_v49  ;;  %v1691_v4 = vmul.f32 %v4703_v22, %v1690_v1  ;;  %v1762_v33 = vmul.f32 %v1730_v40, %v1087_v30 }
 0x1ee   : > { %vm1653_vm6 = vcmp.eq.f32.partialorder %v1652_v63, 8.507059e+37  ;;  %v1670_v47 = vor.u32 1.1754944e-38, %v1669_v28  ;;  %vm1668_vm7 = vcmp.eq.f32.partialorder %v1667_v16, 8.507059e+37  ;;  %vm1678_vm8 = vweird.f32 %v4649_v56  ;;  %v1027_v32 = vpop.f32.mrf.mxu2  ;;  %v1770_v28 = vld [vmem:[#allocation2 + $0x18] sm:$0xff]  ;;  %v1771_v16 = vld [vmem:[#allocation2 + $0x50] sm:$0xff] }
 0x1ef   : > { %v1656_v25 = vsel %vm1653_vm6, %v1655_v17, %v1651_v43  ;;  %v1677_v3 = vadd.f32 %v4699_v26, %v1676_v14  ;;  %vm1679_vm9 = vweird.f32 %v4699_v26  ;;  %v960_v46 = vadd.f32 %v959_v2, %v894_v24  ;;  %v1092_v20 = vpop.f32.mrf.mxu3 }
 0x1f0   : > { %v1671_v51 = vsel %vm1668_vm7, %v1670_v47, %v1666_v19  ;;  %1854 = vmatmul.f32.gmra.mxu0 %v1761_v7  ;;  %1984 = vmatmul.f32.gmra.mxu2 %v1761_v7  ;;  %v1684_v57 = vand.u32 2147483648, %v4649_v56  ;;  %v1692_v23 = vadd.f32 %v4703_v22, %v1691_v4  ;;  %vm1694_vm10 = vweird.f32 %v4703_v22  ;;  %vm4777_vm11 = vmor %vm1678_vm8, %vm1679_vm9  ;;  %v1773_v4 = vld [vmem:[#allocation2 + $0x30] sm:$0xff] }
 0x1f1   : > { %1919 = vmatmul.f32.gmra.mxu1 %v1762_v33  ;;  %v1090_v27 = vadd.f32 %v1089_v44, %v1024_v54  ;;  %v1731_v62 = vmul.f32 %v1656_v25, %v4437_v38  ;;  %v1682_v34 = vand.u32 2147483647, %v4649_v56  ;;  %v1699_v58 = vand.u32 2147483648, %v4653_v12  ;;  %2049 = vmatmul.f32.gmra.mxu3 %v1762_v33  ;;  %v962_v56 = vpop.f32.mrf.mxu1  ;;  %v1772_v44 = vld [vmem:[#allocation2 + $0x68] sm:$0xff] }
 0x1f2   : > { %v1732_v60 = vmul.f32 %v1671_v51, %v4444_v18  ;;  %vm1693_vm12 = vweird.f32 %v4653_v12  ;;  %v1697_v13 = vand.u32 2147483647, %v4653_v12  ;;  %v1681_v38 = vsel %vm4777_vm11, %v4699_v26, %v1677_v3  ;;  %v897_v10 = vpop.f32.mrf.mxu0 }
 0x1f3   : > { %vm1695_vm13 = vmor %vm1693_vm12, %vm1694_vm10  ;;  %v1763_v8 = vmul.f32 %v1731_v62, %v960_v46  ;;  %v1685_v42 = vor.u32 1.1754944e-38, %v1684_v57  ;;  %vm1683_vm14 = vcmp.eq.f32.partialorder %v1682_v34, 8.507059e+37  ;;  %v1700_v39 = vor.u32 1.1754944e-38, %v1699_v58  ;;  %v1774_v57 = vld [vmem:[#allocation2 + $0x48] sm:$0xff]  ;;  %v1775_v62 = vld [vmem:[#allocation2 + $0x80] sm:$0xff] }
 0x1f4   : > { %v1696_v50 = vsel %vm1695_vm13, %v4703_v22, %v1692_v23  ;;  %v1764_v18 = vmul.f32 %v1732_v60, %v1090_v27  ;;  %vm1698_vm15 = vcmp.eq.f32.partialorder %v1697_v13, 8.507059e+37  ;;  %v963_v12 = vadd.f32 %v962_v56, %v897_v10 }
 0x1f5   : > { %v1686_v0 = vsel %vm1683_vm14, %v1685_v42, %v1681_v38  ;;  %v1701_v45 = vsel %vm1698_vm15, %v1700_v39, %v1696_v50  ;;  %v1093_v26 = vadd.f32 %v1092_v20, %v1027_v32 }
 0x1f6   : > { %v1733_v41 = vmul.f32 %v1686_v0, %v4514_v37  ;;  %v1734_v22 = vmul.f32 %v1701_v45, %v4527_v5  ;;  %v1778_v45 = vld [vmem:[#allocation2 + $0xb8] sm:$0xff] }
 0x1f8   : > { %1857 = vmatmul.f32.gmra.mxu0 %v1763_v8  ;;  %1987 = vmatmul.f32.gmra.mxu2 %v1763_v8  ;;  %v1765_v59 = vmul.f32 %v1733_v41, %v963_v12  ;;  %v1766_v48 = vmul.f32 %v1734_v22, %v1093_v26  ;;  %v1776_v8 = vld [vmem:[#allocation2 + $0x88] sm:$0xff]  ;;  %v1779_v41 = vld [vmem:[#allocation2 + $0x60] sm:$0xff] }
 0x1f9   : > { %1922 = vmatmul.f32.gmra.mxu1 %v1764_v18  ;;  %2052 = vmatmul.f32.gmra.mxu3 %v1764_v18  ;;  %v1777_v18 = vld [vmem:[#allocation2 + $0xe8] sm:$0xff] }
 0x200   : > { %1860 = vmatmul.f32.gmra.mxu0 %v1765_v59  ;;  %1990 = vmatmul.f32.gmra.mxu2 %v1765_v59 }
 0x201   : > { %1925 = vmatmul.f32.gmra.mxu1 %v1766_v48  ;;  %2055 = vmatmul.f32.gmra.mxu3 %v1766_v48 }
 0x202   : > { %v1816_v36 = vpop.f32.mrf.mxu0 }
 0x203   : > { %v1881_v53 = vpop.f32.mrf.mxu1 }
 0x204   : > { %v1882_v21 = vadd.f32 %v1881_v53, %v1816_v36 }
 0x206   : > { %v2059_v55 = vadd.f32 %v1882_v21, %v1767_v31  ;;  %v1780_v21 = vld [vmem:[#allocation2 + $0xf0] sm:$0xff] }
 0x208   : > { %2091 = vst [vmem:[#allocation2 + $0xb0] sm:$0xff] %v2059_v55  ;;  %v1946_v9 = vpop.f32.mrf.mxu2 }
 0x20a   : > { %v1819_v29 = vpop.f32.mrf.mxu0  ;;  %v2011_v6 = vpop.f32.mrf.mxu3 }
 0x20b   : > { %v2012_v37 = vadd.f32 %v2011_v6, %v1946_v9  ;;  %v1884_v49 = vpop.f32.mrf.mxu1 }
 0x20c   : > { %v1885_v5 = vadd.f32 %v1884_v49, %v1819_v29  ;;  %v1781_v29 = vld [vmem:[#allocation2 + $0x8] sm:$0xff] }
 0x20d   : > { %v2060_v1 = vadd.f32 %v2012_v37, %v1768_v35 }
 0x20e   : > { %v2061_v30 = vadd.f32 %v1885_v5, %v1769_v11 }
 0x20f   : > { %2092 = vst [vmem:[#allocation2] sm:$0xff] %v2060_v1  ;;  %v1782_v1 = vld [vmem:[#allocation2 + $0x78] sm:$0xff] }
 0x210   : > { %2093 = vst [vmem:[#allocation2 + $0xd8] sm:$0xff] %v2061_v30  ;;  %v1949_v61 = vpop.f32.mrf.mxu2 }
 0x212   : > { %v1822_v63 = vpop.f32.mrf.mxu0  ;;  %v2014_v40 = vpop.f32.mrf.mxu3 }
 0x213   : > { %v2015_v52 = vadd.f32 %v2014_v40, %v1949_v61  ;;  %v1887_v24 = vpop.f32.mrf.mxu1 }
 0x214   : > { %v1888_v2 = vadd.f32 %v1887_v24, %v1822_v63  ;;  %v1783_v63 = vld [vmem:[#allocation2 + $0x38] sm:$0xff] }
 0x215   : > { %v2062_v43 = vadd.f32 %v2015_v52, %v1770_v28 }
 0x216   : > { %v2063_v14 = vadd.f32 %v1888_v2, %v1771_v16 }
 0x217   : > { %2094 = vst [vmem:[#allocation2 + $0x18] sm:$0xff] %v2062_v43  ;;  %v1784_v43 = vld [vmem:[#allocation2 + $0x58] sm:$0xff] }
 0x218   : > { %2095 = vst [vmem:[#allocation2 + $0x50] sm:$0xff] %v2063_v14  ;;  %v1952_v7 = vpop.f32.mrf.mxu2 }
 0x21a   : > { %v1825_v54 = vpop.f32.mrf.mxu0  ;;  %v2017_v17 = vpop.f32.mrf.mxu3 }
 0x21b   : > { %v2018_v19 = vadd.f32 %v2017_v17, %v1952_v7  ;;  %v1890_v33 = vpop.f32.mrf.mxu1 }
 0x21c   : > { %v1891_v47 = vadd.f32 %v1890_v33, %v1825_v54  ;;  %v1785_v54 = vld [vmem:[#allocation2 + $0x40] sm:$0xff] }
 0x21d   : > { %v2064_v25 = vadd.f32 %v2018_v19, %v1772_v44 }
 0x21e   : > { %v2065_v51 = vadd.f32 %v1891_v47, %v1773_v4 }
 0x21f   : > { %2096 = vst [vmem:[#allocation2 + $0x68] sm:$0xff] %v2064_v25  ;;  %v1786_v25 = vld [vmem:[#allocation2 + $0xc8] sm:$0xff] }
 0x220   : > { %2097 = vst [vmem:[#allocation2 + $0x30] sm:$0xff] %v2065_v51  ;;  %v1955_v3 = vpop.f32.mrf.mxu2 }
 0x222   : > { %v1828_v46 = vpop.f32.mrf.mxu0  ;;  %v2020_v23 = vpop.f32.mrf.mxu3 }
 0x223   : > { %v2021_v27 = vadd.f32 %v2020_v23, %v1955_v3  ;;  %v1893_v34 = vpop.f32.mrf.mxu1 }
 0x224   : > { %v1894_v58 = vadd.f32 %v1893_v34, %v1828_v46  ;;  %v1787_v46 = vld [vmem:[#allocation2 + $0xe0] sm:$0xff] }
 0x225   : > { %v2066_v60 = vadd.f32 %v2021_v27, %v1774_v57 }
 0x226   : > { %v2067_v15 = vadd.f32 %v1894_v58, %v1775_v62 }
 0x227   : > { %2098 = vst [vmem:[#allocation2 + $0x48] sm:$0xff] %v2066_v60  ;;  %v1788_v60 = vld [vmem:[#allocation2 + $0x90] sm:$0xff] }
 0x228   : > { %2099 = vst [vmem:[#allocation2 + $0x80] sm:$0xff] %v2067_v15  ;;  %v1958_v13 = vpop.f32.mrf.mxu2 }
 0x22a   : > { %v1831_v38 = vpop.f32.mrf.mxu0  ;;  %v2023_v42 = vpop.f32.mrf.mxu3 }
 0x22b   : > { %v2024_v50 = vadd.f32 %v2023_v42, %v1958_v13 }
 0x22c   : > { %v1896_v10 = vpop.f32.mrf.mxu1 }
 0x22d   : > { %v1897_v56 = vadd.f32 %v1896_v10, %v1831_v38  ;;  %v2068_v39 = vadd.f32 %v2024_v50, %v1776_v8  ;;  %v1789_v38 = vld [vmem:[#allocation2 + $0x70] sm:$0xff] }
 0x22f   : > { %v2069_v32 = vadd.f32 %v1897_v56, %v1777_v18  ;;  %2100 = vst [vmem:[#allocation2 + $0x88] sm:$0xff] %v2068_v39  ;;  %v1790_v39 = vld [vmem:[#allocation2 + $0xc0] sm:$0xff] }
 0x230   : > { %v1961_v20 = vpop.f32.mrf.mxu2 }
 0x231   : > { %2101 = vst [vmem:[#allocation2 + $0xe8] sm:$0xff] %v2069_v32 }
 0x232   : > { %v2026_v12 = vpop.f32.mrf.mxu3 }
 0x233   : > { %v1834_v0 = vpop.f32.mrf.mxu0  ;;  %v2027_v26 = vadd.f32 %v2026_v12, %v1961_v20 }
 0x234   : > { %v1899_v22 = vpop.f32.mrf.mxu1 }
 0x235   : > { %v1900_v59 = vadd.f32 %v1899_v22, %v1834_v0  ;;  %v2070_v48 = vadd.f32 %v2027_v26, %v1778_v45  ;;  %v1791_v0 = vld [vmem:[#allocation2 + $0xa8] sm:$0xff] }
 0x237   : > { %v2071_v36 = vadd.f32 %v1900_v59, %v1779_v41  ;;  %2102 = vst [vmem:[#allocation2 + $0xb8] sm:$0xff] %v2070_v48  ;;  %v1792_v48 = vld [vmem:[#allocation2 + $0xd0] sm:$0xff] }
 0x239   : > { %2103 = vst [vmem:[#allocation2 + $0x60] sm:$0xff] %v2071_v36  ;;  %v1964_v31 = vpop.f32.mrf.mxu2 }
 0x23a   : > { %v2029_v55 = vpop.f32.mrf.mxu3 }
 0x23b   : > { %v2030_v9 = vadd.f32 %v2029_v55, %v1964_v31 }
 0x23c   : > { %v1837_v53 = vpop.f32.mrf.mxu0 }
 0x23d   : > { %v1902_v35 = vpop.f32.mrf.mxu1  ;;  %v2072_v37 = vadd.f32 %v2030_v9, %v1780_v21 }
 0x23e   : > { %v1903_v6 = vadd.f32 %v1902_v35, %v1837_v53  ;;  %v1793_v53 = vld [vmem:[#allocation2 + $0x10] sm:$0xff] }
 0x23f   : > { %2104 = vst [vmem:[#allocation2 + $0xf0] sm:$0xff] %v2072_v37  ;;  %v1794_v37 = vld [vmem:[#allocation2 + $0x28] sm:$0xff] }
 0x240   : > { %v2073_v11 = vadd.f32 %v1903_v6, %v1781_v29 }
 0x242   : > { %2105 = vst [vmem:[#allocation2 + $0x8] sm:$0xff] %v2073_v11  ;;  %v1967_v49 = vpop.f32.mrf.mxu2 }
 0x243   : > { %v2032_v30 = vpop.f32.mrf.mxu3 }
 0x244   : > { %v1840_v5 = vpop.f32.mrf.mxu0  ;;  %v2033_v61 = vadd.f32 %v2032_v30, %v1967_v49 }
 0x246   : > { %v1905_v28 = vpop.f32.mrf.mxu1  ;;  %v2074_v52 = vadd.f32 %v2033_v61, %v1782_v1 }
 0x247   : > { %v1906_v40 = vadd.f32 %v1905_v28, %v1840_v5  ;;  %v1795_v5 = vld [vmem:[#allocation2 + $0xa0] sm:$0xff] }
 0x248   : > { %2106 = vst [vmem:[#allocation2 + $0x78] sm:$0xff] %v2074_v52 }
 0x249   : > { %v2075_v16 = vadd.f32 %v1906_v40, %v1783_v63  ;;  %v1796_v40 = vld [vmem:[#allocation2 + $0xf8] sm:$0xff] }
 0x24a   : > { %v1970_v24 = vpop.f32.mrf.mxu2 }
 0x24b   : > { %2107 = vst [vmem:[#allocation2 + $0x38] sm:$0xff] %v2075_v16 }
 0x24c   : > { %v2035_v14 = vpop.f32.mrf.mxu3 }
 0x24d   : > { %v1843_v2 = vpop.f32.mrf.mxu0  ;;  %v2036_v7 = vadd.f32 %v2035_v14, %v1970_v24 }
 0x24e   : > { %v1908_v44 = vpop.f32.mrf.mxu1 }
 0x24f   : > { %v1909_v17 = vadd.f32 %v1908_v44, %v1843_v2  ;;  %v2076_v19 = vadd.f32 %v2036_v7, %v1784_v43  ;;  %v1797_v2 = vld [vmem:[#allocation2 + $0x20] sm:$0xff] }
 0x251   : > { %v2077_v4 = vadd.f32 %v1909_v17, %v1785_v54  ;;  %2108 = vst [vmem:[#allocation2 + $0x58] sm:$0xff] %v2076_v19  ;;  %v1798_v17 = vld [vmem:[#allocation2 + $0x98] sm:$0xff] }
 0x253   : > { %2109 = vst [vmem:[#allocation2 + $0x40] sm:$0xff] %v2077_v4  ;;  %v1973_v33 = vpop.f32.mrf.mxu2 }
 0x254   : > { %v2038_v51 = vpop.f32.mrf.mxu3 }
 0x255   : > { %v1846_v47 = vpop.f32.mrf.mxu0  ;;  %v2039_v3 = vadd.f32 %v2038_v51, %v1973_v33 }
 0x256   : > { %v1911_v57 = vpop.f32.mrf.mxu1 }
 0x257   : > { %v1912_v23 = vadd.f32 %v1911_v57, %v1846_v47  ;;  %v2078_v27 = vadd.f32 %v2039_v3, %v1786_v25 }
 0x259   : > { %v2079_v62 = vadd.f32 %v1912_v23, %v1787_v46  ;;  %2110 = vst [vmem:[#allocation2 + $0xc8] sm:$0xff] %v2078_v27 }
 0x25b   : > { %2111 = vst [vmem:[#allocation2 + $0xe0] sm:$0xff] %v2079_v62  ;;  %v1976_v34 = vpop.f32.mrf.mxu2 }
 0x25c   : > { %v2041_v15 = vpop.f32.mrf.mxu3 }
 0x25d   : > { %v1849_v58 = vpop.f32.mrf.mxu0  ;;  %v2042_v13 = vadd.f32 %v2041_v15, %v1976_v34 }
 0x25e   : > { %v1914_v8 = vpop.f32.mrf.mxu1 }
 0x25f   : > { %v1915_v42 = vadd.f32 %v1914_v8, %v1849_v58  ;;  %v2080_v50 = vadd.f32 %v2042_v13, %v1788_v60 }
 0x261   : > { %v2081_v18 = vadd.f32 %v1915_v42, %v1789_v38  ;;  %2112 = vst [vmem:[#allocation2 + $0x90] sm:$0xff] %v2080_v50 }
 0x263   : > { %2113 = vst [vmem:[#allocation2 + $0x70] sm:$0xff] %v2081_v18  ;;  %v1979_v10 = vpop.f32.mrf.mxu2 }
 0x264   : > { %v2044_v32 = vpop.f32.mrf.mxu3 }
 0x265   : > { %v1852_v56 = vpop.f32.mrf.mxu0  ;;  %v2045_v20 = vadd.f32 %v2044_v32, %v1979_v10 }
 0x266   : > { %v1917_v45 = vpop.f32.mrf.mxu1 }
 0x267   : > { %v1918_v12 = vadd.f32 %v1917_v45, %v1852_v56  ;;  %v2082_v26 = vadd.f32 %v2045_v20, %v1790_v39 }
 0x269   : > { %v2083_v41 = vadd.f32 %v1918_v12, %v1791_v0  ;;  %2114 = vst [vmem:[#allocation2 + $0xc0] sm:$0xff] %v2082_v26 }
 0x26b   : > { %2115 = vst [vmem:[#allocation2 + $0xa8] sm:$0xff] %v2083_v41  ;;  %v1982_v22 = vpop.f32.mrf.mxu2 }
 0x26c   : > { %v2047_v36 = vpop.f32.mrf.mxu3 }
 0x26d   : > { %v1855_v59 = vpop.f32.mrf.mxu0  ;;  %v2048_v31 = vadd.f32 %v2047_v36, %v1982_v22 }
 0x26e   : > { %v1920_v21 = vpop.f32.mrf.mxu1 }
 0x26f   : > { %v1921_v55 = vadd.f32 %v1920_v21, %v1855_v59  ;;  %v2084_v9 = vadd.f32 %v2048_v31, %v1792_v48 }
 0x271   : > { %v2085_v29 = vadd.f32 %v1921_v55, %v1793_v53  ;;  %2116 = vst [vmem:[#allocation2 + $0xd0] sm:$0xff] %v2084_v9 }
 0x273   : > { %2117 = vst [vmem:[#allocation2 + $0x10] sm:$0xff] %v2085_v29  ;;  %v1985_v35 = vpop.f32.mrf.mxu2 }
 0x274   : > { %v2050_v11 = vpop.f32.mrf.mxu3 }
 0x275   : > { %v1858_v6 = vpop.f32.mrf.mxu0  ;;  %v2051_v49 = vadd.f32 %v2050_v11, %v1985_v35 }
 0x276   : > { %v1923_v1 = vpop.f32.mrf.mxu1 }
 0x277   : > { %v1924_v30 = vadd.f32 %v1923_v1, %v1858_v6  ;;  %v2086_v61 = vadd.f32 %v2051_v49, %v1794_v37 }
 0x279   : > { %v2087_v63 = vadd.f32 %v1924_v30, %v1795_v5  ;;  %2118 = vst [vmem:[#allocation2 + $0x28] sm:$0xff] %v2086_v61 }
 0x27b   : > { %2119 = vst [vmem:[#allocation2 + $0xa0] sm:$0xff] %v2087_v63  ;;  %v1988_v28 = vpop.f32.mrf.mxu2 }
 0x27c   : > { %v2053_v52 = vpop.f32.mrf.mxu3 }
 0x27d   : > { %v1861_v16 = vpop.f32.mrf.mxu0  ;;  %v2054_v24 = vadd.f32 %v2053_v52, %v1988_v28 }
 0x27e   : > { %v1926_v43 = vpop.f32.mrf.mxu1 }
 0x27f   : > { %v1927_v14 = vadd.f32 %v1926_v43, %v1861_v16  ;;  %v2088_v7 = vadd.f32 %v2054_v24, %v1796_v40 }
 0x281   : > { %v2089_v54 = vadd.f32 %v1927_v14, %v1797_v2  ;;  %2120 = vst [vmem:[#allocation2 + $0xf8] sm:$0xff] %v2088_v7 }
 0x283   : > { %2121 = vst [vmem:[#allocation2 + $0x20] sm:$0xff] %v2089_v54  ;;  %v1991_v44 = vpop.f32.mrf.mxu2 }
 0x284   : > { %v2056_v19 = vpop.f32.mrf.mxu3 }
 0x285   : > { %v2057_v4 = vadd.f32 %v2056_v19, %v1991_v44  ;;  %2126 = sbr.rel (%p2493_p2) target bundleno = 812 (0x32c), region = 56 }
 0x287   : > { %v2090_v33 = vadd.f32 %v2057_v4, %v1798_v17 }
 0x289   : > { %2122 = vst [vmem:[#allocation2 + $0x98] sm:$0xff] %v2090_v33 }
 0x28a   : > { %v2163_v47 = vld [vmem:[%s4863_s3 + $0x20] sm:$0xff]  ;;  %v2161_v25 = vld [vmem:[%s4863_s3 + $0x10] sm:$0xff]  ;;  %v2904_v3 = vmov 0   ;;  %v2164_v46 = vld [vmem:[%s4863_s3 + $0x28] sm:$0xff] }
 0x28b   : > { %v2159_v51 = vld [vmem:[%s4863_s3] sm:$0xff]  ;;  %2718 = vset.pattern.permute.xlu2 %v2904_v3  ;;  %2717 = vset.pattern.permute.xlu1 %v2904_v3  ;;  %v2162_v57 = vld [vmem:[%s4863_s3 + $0x18] sm:$0xff]  ;;  %v2160_v23 = vld [vmem:[%s4863_s3 + $0x8] sm:$0xff] }
 0x28c   : > { %2716 = vset.pattern.permute.xlu0 %v2904_v3  ;;  %2197 = vperm.xlu2 %2718, %v2163_v47   ;;  %v2167_v27 = vld [vmem:[%s4863_s3 + $0x40] sm:$0xff]  ;;  %v2166_v62 = vld [vmem:[%s4863_s3 + $0x38] sm:$0xff]  ;;  %v2165_v34 = vld [vmem:[%s4863_s3 + $0x30] sm:$0xff] }
 0x28d   : > { %2187 = vperm.xlu1 %2717, %v2161_v25   ;;  %2177 = vperm.xlu0 %2716, %v2159_v51   ;;  %v2170_v58 = vld [vmem:[%s4863_s3 + $0x58] sm:$0xff]  ;;  %v2169_v60 = vld [vmem:[%s4863_s3 + $0x50] sm:$0xff]  ;;  %v2168_v15 = vld [vmem:[%s4863_s3 + $0x48] sm:$0xff] }
 0x28e   : > { %v2173_v13 = vld [vmem:[%s4863_s3 + $0x70] sm:$0xff]  ;;  %v2172_v38 = vld [vmem:[%s4863_s3 + $0x68] sm:$0xff]  ;;  %v2171_v8 = vld [vmem:[%s4863_s3 + $0x60] sm:$0xff] }
 0x28f   : > { %v2174_v42 = vld [vmem:[%s4863_s3 + $0x78] sm:$0xff]  ;;  %v2135_v50 = vld [vmem:[#allocation2 + $0x80] sm:$0xff]  ;;  %v2136_v18 = vld [vmem:[#allocation2 + $0x88] sm:$0xff] }
 0x290   : > { %v2137_v32 = vld [vmem:[#allocation2 + $0xe8] sm:$0xff]  ;;  %v2138_v20 = vld [vmem:[#allocation2 + $0xb8] sm:$0xff]  ;;  %v2149_v36 = vld [vmem:[#allocation2 + $0x70] sm:$0xff] }
 0x291   : > { %v2143_v26 = vld [vmem:[#allocation2 + $0x38] sm:$0xff]  ;;  %v2150_v31 = vld [vmem:[#allocation2 + $0xc0] sm:$0xff]  ;;  %v2131_v53 = vld [vmem:[#allocation2 + $0x50] sm:$0xff] }
 0x292   : > { %v2144_v41 = vld [vmem:[#allocation2 + $0x58] sm:$0xff]  ;;  %v2132_v21 = vld [vmem:[#allocation2 + $0x68] sm:$0xff]  ;;  %v2127_v9 = vld [vmem:[#allocation2 + $0xb0] sm:$0xff] }
 0x293   : > { %v2128_v11 = vld [vmem:[#allocation2] sm:$0xff]  ;;  %v2156_v63 = vld [vmem:[#allocation2 + $0xf8] sm:$0xff]  ;;  %v2133_v28 = vld [vmem:[#allocation2 + $0x30] sm:$0xff] }
 0x294   : > { %2202 = vperm.xlu2 %2718, %v2164_v46   ;;  %v2155_v61 = vld [vmem:[#allocation2 + $0xa0] sm:$0xff]  ;;  %v2134_v40 = vld [vmem:[#allocation2 + $0x48] sm:$0xff]  ;;  %v2129_v16 = vld [vmem:[#allocation2 + $0xd8] sm:$0xff] }
 0x295   : > { %2192 = vperm.xlu1 %2717, %v2162_v57   ;;  %2182 = vperm.xlu0 %2716, %v2160_v23   ;;  %v2130_v7 = vld [vmem:[#allocation2 + $0x18] sm:$0xff]  ;;  %v2141_v4 = vld [vmem:[#allocation2 + $0x8] sm:$0xff]  ;;  %v2139_v47 = vld [vmem:[#allocation2 + $0x60] sm:$0xff] }
 0x296   : > { %v2142_v33 = vld [vmem:[#allocation2 + $0x78] sm:$0xff]  ;;  %v2140_v25 = vld [vmem:[#allocation2 + $0xf0] sm:$0xff] }
 0x29c   : > { %2217 = vperm.xlu2 %2718, %v2167_v27  }
 0x29d   : > { %2212 = vperm.xlu1 %2717, %v2166_v62   ;;  %2207 = vperm.xlu0 %2716, %v2165_v34   ;;  %v2147_v62 = vld [vmem:[#allocation2 + $0xe0] sm:$0xff]  ;;  %v2148_v34 = vld [vmem:[#allocation2 + $0x90] sm:$0xff] }
 0x2a4   : > { %2232 = vperm.xlu2 %2718, %v2170_v58   ;;  %v2145_v58 = vld [vmem:[#allocation2 + $0x40] sm:$0xff] }
 0x2a5   : > { %2227 = vperm.xlu1 %2717, %v2169_v60   ;;  %2222 = vperm.xlu0 %2716, %v2168_v15   ;;  %v2146_v60 = vld [vmem:[#allocation2 + $0xc8] sm:$0xff] }
 0x2ac   : > { %2247 = vperm.xlu2 %2718, %v2173_v13  }
 0x2ad   : > { %2242 = vperm.xlu1 %2717, %v2172_v38   ;;  %2237 = vperm.xlu0 %2716, %v2171_v8  }
 0x2b5   : > { %2252 = vperm.xlu0 %2716, %v2174_v42  }
 0x2e6   : > { %v2198_v10 = vpop.permute.xlu2 %2197 }
 0x2e7   : > { %v2263_v56 = vmul.f32 %v2198_v10, %v2135_v50  ;;  %v2264_v39 = vmul.f32 %v2198_v10, %v2136_v18  ;;  %v2153_v18 = vld [vmem:[#allocation2 + $0x10] sm:$0xff]  ;;  %v2154_v10 = vld [vmem:[#allocation2 + $0x28] sm:$0xff] }
 0x2e9   : > { %2295 = vst [vmem:[#allocation9 + $0x40] sm:$0xff] %v2263_v56  ;;  %v2151_v56 = vld [vmem:[#allocation2 + $0xa8] sm:$0xff] }
 0x2ea   : > { %2296 = vst [vmem:[#allocation9 + $0x48] sm:$0xff] %v2264_v39  ;;  %v2152_v39 = vld [vmem:[#allocation2 + $0xd0] sm:$0xff] }
 0x2ee   : > { %v2203_v0 = vpop.permute.xlu2 %2202 }
 0x2ef   : > { %v2265_v45 = vmul.f32 %v2203_v0, %v2137_v32  ;;  %v2266_v12 = vmul.f32 %v2203_v0, %v2138_v20 }
 0x2f1   : > { %2297 = vst [vmem:[#allocation9 + $0x50] sm:$0xff] %v2265_v45 }
 0x2f2   : > { %2298 = vst [vmem:[#allocation9 + $0x58] sm:$0xff] %v2266_v12 }
 0x2f6   : > { %v2218_v22 = vpop.permute.xlu2 %2217 }
 0x2f7   : > { %v2271_v59 = vmul.f32 %v2218_v22, %v2143_v26  ;;  %v2272_v48 = vmul.f32 %v2218_v22, %v2144_v41  ;;  %v2157_v41 = vld [vmem:[#allocation2 + $0x20] sm:$0xff]  ;;  %v2158_v22 = vld [vmem:[#allocation2 + $0x98] sm:$0xff] }
 0x2f9   : > { %2303 = vst [vmem:[#allocation9 + $0x80] sm:$0xff] %v2271_v59 }
 0x2fa   : > { %2304 = vst [vmem:[#allocation9 + $0x88] sm:$0xff] %v2272_v48 }
 0x2fe   : > { %v2233_v55 = vpop.permute.xlu2 %2232 }
 0x2ff   : > { %v2277_v29 = vmul.f32 %v2233_v55, %v2149_v36  ;;  %v2278_v35 = vmul.f32 %v2233_v55, %v2150_v31  ;;  %v2188_v6 = vpop.permute.xlu1 %2187  ;;  %v2178_v37 = vpop.permute.xlu0 %2177 }
 0x300   : > { %v2259_v49 = vmul.f32 %v2188_v6, %v2131_v53  ;;  %v2260_v5 = vmul.f32 %v2188_v6, %v2132_v21  ;;  %v2255_v1 = vmul.f32 %v2178_v37, %v2127_v9  ;;  %v2256_v30 = vmul.f32 %v2178_v37, %v2128_v11 }
 0x301   : > { %2309 = vst [vmem:[#allocation9 + $0xb0] sm:$0xff] %v2277_v29 }
 0x302   : > { %2310 = vst [vmem:[#allocation9 + $0xb8] sm:$0xff] %v2278_v35 }
 0x303   : > { %2291 = vst [vmem:[#allocation9 + $0x20] sm:$0xff] %v2259_v49 }
 0x304   : > { %2292 = vst [vmem:[#allocation9 + $0x28] sm:$0xff] %v2260_v5 }
 0x305   : > { %2287 = vst [vmem:[#allocation9] sm:$0xff] %v2255_v1 }
 0x306   : > { %2288 = vst [vmem:[#allocation9 + $0x8] sm:$0xff] %v2256_v30  ;;  %v2248_v52 = vpop.permute.xlu2 %2247 }
 0x307   : > { %v2283_v24 = vmul.f32 %v2248_v52, %v2155_v61  ;;  %v2284_v2 = vmul.f32 %v2248_v52, %v2156_v63  ;;  %v2193_v43 = vpop.permute.xlu1 %2192  ;;  %v2183_v14 = vpop.permute.xlu0 %2182 }
 0x308   : > { %v2261_v54 = vmul.f32 %v2193_v43, %v2133_v28  ;;  %v2262_v44 = vmul.f32 %v2193_v43, %v2134_v40  ;;  %v2257_v17 = vmul.f32 %v2183_v14, %v2129_v16  ;;  %v2258_v19 = vmul.f32 %v2183_v14, %v2130_v7 }
 0x309   : > { %2315 = vst [vmem:[#allocation9 + $0xe0] sm:$0xff] %v2283_v24 }
 0x30a   : > { %2316 = vst [vmem:[#allocation9 + $0xe8] sm:$0xff] %v2284_v2 }
 0x30b   : > { %2293 = vst [vmem:[#allocation9 + $0x30] sm:$0xff] %v2261_v54 }
 0x30c   : > { %2294 = vst [vmem:[#allocation9 + $0x38] sm:$0xff] %v2262_v44 }
 0x30d   : > { %2289 = vst [vmem:[#allocation9 + $0x10] sm:$0xff] %v2257_v17 }
 0x30e   : > { %2290 = vst [vmem:[#allocation9 + $0x18] sm:$0xff] %v2258_v19 }
 0x30f   : > { %v2213_v51 = vpop.permute.xlu1 %2212  ;;  %v2208_v3 = vpop.permute.xlu0 %2207 }
 0x310   : > { %v2269_v46 = vmul.f32 %v2213_v51, %v2141_v4  ;;  %v2270_v57 = vmul.f32 %v2213_v51, %v2142_v33  ;;  %v2267_v23 = vmul.f32 %v2208_v3, %v2139_v47  ;;  %v2268_v27 = vmul.f32 %v2208_v3, %v2140_v25 }
 0x312   : > { %2301 = vst [vmem:[#allocation9 + $0x70] sm:$0xff] %v2269_v46 }
 0x313   : > { %2302 = vst [vmem:[#allocation9 + $0x78] sm:$0xff] %v2270_v57 }
 0x314   : > { %2299 = vst [vmem:[#allocation9 + $0x60] sm:$0xff] %v2267_v23 }
 0x315   : > { %2300 = vst [vmem:[#allocation9 + $0x68] sm:$0xff] %v2268_v27 }
 0x317   : > { %v2228_v15 = vpop.permute.xlu1 %2227  ;;  %v2223_v13 = vpop.permute.xlu0 %2222 }
 0x318   : > { %v2275_v38 = vmul.f32 %v2228_v15, %v2147_v62  ;;  %v2276_v8 = vmul.f32 %v2228_v15, %v2148_v34  ;;  %v2273_v42 = vmul.f32 %v2223_v13, %v2145_v58  ;;  %v2274_v50 = vmul.f32 %v2223_v13, %v2146_v60 }
 0x31a   : > { %2307 = vst [vmem:[#allocation9 + $0xa0] sm:$0xff] %v2275_v38 }
 0x31b   : > { %2308 = vst [vmem:[#allocation9 + $0xa8] sm:$0xff] %v2276_v8 }
 0x31c   : > { %2305 = vst [vmem:[#allocation9 + $0x90] sm:$0xff] %v2273_v42 }
 0x31d   : > { %2306 = vst [vmem:[#allocation9 + $0x98] sm:$0xff] %v2274_v50 }
 0x31f   : > { %v2243_v32 = vpop.permute.xlu1 %2242  ;;  %v2238_v20 = vpop.permute.xlu0 %2237 }
 0x320   : > { %v2281_v0 = vmul.f32 %v2243_v32, %v2153_v18  ;;  %v2282_v45 = vmul.f32 %v2243_v32, %v2154_v10  ;;  %v2279_v12 = vmul.f32 %v2238_v20, %v2151_v56  ;;  %v2280_v26 = vmul.f32 %v2238_v20, %v2152_v39 }
 0x322   : > { %2313 = vst [vmem:[#allocation9 + $0xd0] sm:$0xff] %v2281_v0 }
 0x323   : > { %2314 = vst [vmem:[#allocation9 + $0xd8] sm:$0xff] %v2282_v45 }
 0x324   : > { %2311 = vst [vmem:[#allocation9 + $0xc0] sm:$0xff] %v2279_v12 }
 0x325   : > { %2312 = vst [vmem:[#allocation9 + $0xc8] sm:$0xff] %v2280_v26 }
 0x327   : > { %v2253_v59 = vpop.permute.xlu0 %2252 }
 0x328   : > { %v2285_v48 = vmul.f32 %v2253_v59, %v2157_v41  ;;  %v2286_v36 = vmul.f32 %v2253_v59, %v2158_v22 }
 0x32a   : > { %2317 = vst [vmem:[#allocation9 + $0xf0] sm:$0xff] %v2285_v48 }
 0x32b   : > { %2318 = vst [vmem:[#allocation9 + $0xf8] sm:$0xff] %v2286_v36 }
 0x32c PF: > { %p2527_p3 = scmp.eq.s32.totalorder %s3000_s22, 1  ;;  %s2330_s30 = sshll.u32 %s4864_s4, 4  ;;  %s2331_s30 = int_to_ptr.hbm [resolvable:$true] %s2330_s30 }
 0x32d   : > { %s2905_s5 = smov [#allocation9]   ;;  %s2906_s11 = smov 256  }
 0x32e   : > { %s2328_s10 = sshll.u32 %s2905_s5, 4  ;;  %s2907_s23 = smov 16   ;;  %s2329_s10 = int_to_ptr.vmem [resolvable:$true] %s2328_s10 }
 0x32f   : > { %2510 = dma.vmem_to_hbm [thread:$0]  (%p2527_p3), %s2329_s10, 4096, %s2331_s30, [#allocation5], %s2906_s11, %s2906_s11, %s2907_s23  }
 0x330   : > { %2870 = dma.done.wait (%p2527_p3), [#allocation5], 4096  }
 0x331   : > { %2872 = vsyncadd (%p2527_p3), [#allocation5], 4294963200 }
 0x332 PF: > { %s19_s20 = sadd.s32 1, %s2895_s20   ;;  %s5033_s15 = smov %s2879_s16 }
 0x333   : > { %p16_p4 = scmp.ge.s32.totalorder %s19_s20, 4   ;;  %s5034_s16 = smov %s2883_s17 }
 0x334   : > { %s5035_s17 = smov %s2981_s28  ;;  %s5036_s18 = smov %s2891_s19 }
 0x335   : > { %s5037_s19 = smov %s5039_s21  ;;  %18 = sbr.rel (!%p16_p4) target bundleno = 6 (0x6), region = 102 }
 0x33a   :  { %2347 = vsyncpa [#allocation4], 1 }
 0x33b   :  { %2349 = vsyncpa [#allocation4 + $0x1], 1 }
 0x33c   :  { %2350 = vsyncpa [#allocation7], 1 }
 0x33d   :  { %2352 = vsyncpa [#allocation7 + $0x1], 1 }
 0x33e   :  { %2353 = vsyncpa [#allocation5], 1 }
 0x33f   :  { %2355 = vsyncpa [#allocation5 + $0x1], 1 }

</bundles_post_ra>
